<compile_context>
chip_gen: v7x
topology: tpu7x:2x2x1
jax: 0.10.0
libtpu: 0.0.40
codegen_flags: <defaults>
</compile_context>

<pallas_src>
import functools
import math

import jax
import jax.numpy as jnp
from jax import lax
from jax.experimental import pallas as pl
from jax.experimental.pallas import tpu as pltpu
import numpy as np


def _round_up(x, m):
    return ((x + m - 1) // m) * m


@functools.lru_cache(maxsize=None)
def _vmem_budget_bytes():
    """Per-core VMEM budget with headroom for Mosaic internal scratch."""
    try:
        cap = int(pltpu.get_tpu_info().vmem_capacity_bytes)
    except Exception:               # conservative default: assume v7x-sized VMEM
        cap = 64 << 20
    if cap <= (64 << 20):           # v7x: 64 MiB per TensorCore -> real headroom
        return int(max(min(cap - (12 << 20), 52 << 20), 24 << 20))
    return int(min(cap * 3 // 4, 100 << 20))   # v5e / v6e: 128 MiB physical


# ----------------------------------------------------------------------------
# Kernel 1: A^T = matrix_exp((W^T - W) / 2)   (== matrix_exp((W - W^T)/2)^T)
# ----------------------------------------------------------------------------
_EXPM_TAYLOR_DEG = 12
_INV_FACT = [1.0 / math.factorial(k) for k in range(_EXPM_TAYLOR_DEG + 1)]
_MAX_SQUARINGS = 12                 # handles skew inf-norms up to ~2^11 exactly


def expm_t_kernel(w_ref, at_ref):
    d = w_ref.shape[0]
    w = w_ref[...].astype(jnp.float32)
    # Transposed skew-symmetric part; exp of it is A^T (cold path, one XLU transpose).
    skew_t = (w.T - w) * 0.5

    # Norm-adaptive scaling-and-squaring: pick s so ||skew_t / 2^s||_inf <= 0.5,
    # where the degree-12 Taylor remainder is ~2e-14 (well below f32 eps).
    norm = jnp.max(jnp.sum(jnp.abs(skew_t), axis=-1, keepdims=True))
    s_f = jnp.clip(jnp.ceil(jnp.log2(jnp.maximum(norm, 1e-30))) + 1.0,
                   0.0, float(_MAX_SQUARINGS))
    s = s_f.astype(jnp.int32)
    # Exact power-of-two scale (repeated halving; multiplications by 0.5 are exact).
    scale = lax.fori_loop(
        0, _MAX_SQUARINGS,
        lambda i, v: jnp.where(i < s, v * jnp.float32(0.5), v),
        jnp.float32(1.0))
    x = skew_t * scale

    row = lax.broadcasted_iota(jnp.int32, (d, d), 0)
    col = lax.broadcasted_iota(jnp.int32, (d, d), 1)
    eye = (row == col).astype(jnp.float32)

    dot = functools.partial(jnp.dot, preferred_element_type=jnp.float32)

    # Paterson–Stockmeyer for sum_{k=0..12} x^k / k!  (5 matmuls instead of 12).
    x2 = dot(x, x)
    x3 = dot(x2, x)
    x4 = dot(x2, x2)
    c = _INV_FACT
    b0 = c[0] * eye + c[1] * x + c[2] * x2 + c[3] * x3
    b1 = c[4] * eye + c[5] * x + c[6] * x2 + c[7] * x3
    b2 = c[8] * eye + c[9] * x + c[10] * x2 + c[11] * x3 + c[12] * x4
    p = b0 + dot(x4, b1 + dot(x4, b2))

    # Undo scaling: square exactly s times (fixed-bound loop + select; cold path).
    def _square(i, acc):
        return jnp.where(i < s, dot(acc, acc), acc)
    p = lax.fori_loop(0, _MAX_SQUARINGS, _square, p)

    at_ref[...] = p.astype(at_ref.dtype)


def expm_skew_t_pallas(weight, out_dtype):
    d = weight.shape[0]
    budget = _vmem_budget_bytes()
    # ~12-16 live (d,d) f32 temporaries plus in/out buffers.
    needed = 16 * d * d * 4 + (2 << 20)
    if needed > budget:
        # TODO(synk): projector dims whose expm working set exceeds VMEM fall back to
        # XLA's norm-adaptive expm instead of a blocked in-VMEM Pallas variant.
        skew_t = (weight.T - weight).astype(jnp.float32) * 0.5
        return jax.scipy.linalg.expm(skew_t).astype(out_dtype)

    return pl.pallas_call(
        expm_t_kernel,
        out_shape=jax.ShapeDtypeStruct((d, d), out_dtype),
        grid_spec=pltpu.PrefetchScalarGridSpec(
            num_scalar_prefetch=0,
            grid=(1,),
            in_specs=[pl.BlockSpec((d, d), lambda i: (0, 0),
                                   pipeline_mode=pl.Buffered(1))],
            out_specs=pl.BlockSpec((d, d), lambda i: (0, 0)),
        ),
        compiler_params=pltpu.CompilerParams(
            vmem_limit_bytes=int(min(max(needed, 8 << 20), budget)),
        ),
    )(weight)


# ----------------------------------------------------------------------------
# Kernel 2 (hot path): projected = x @ A^T   (A^T supplied pre-transposed)
# ----------------------------------------------------------------------------
def linear_kernel(x_ref, at_ref, o_ref):
    o_ref[...] = jnp.dot(
        x_ref[...], at_ref[...], preferred_element_type=jnp.float32
    ).astype(o_ref.dtype)


def matmul_tiled_kernel(x_ref, at_ref, o_ref, acc_ref):
    @pl.when(pl.program_id(2) == 0)
    def _():
        acc_ref[...] = jnp.zeros_like(acc_ref)

    acc_ref[...] += jnp.dot(x_ref[...], at_ref[...],
                            preferred_element_type=jnp.float32)

    @pl.when(pl.program_id(2) == pl.num_programs(2) - 1)
    def _():
        o_ref[...] = acc_ref[...].astype(o_ref.dtype)


def _choose_tile_m(m, d, itemsize, at_bytes, budget):
    # Fit double-buffered x + out tiles next to the single-buffered resident A^T.
    per_row = 4 * d * itemsize
    cap_rows = max(16, int((budget - at_bytes - (2 << 20)) // per_row))
    # Big lane-dense tiles amortize the ~0.35us per-grid-step overhead.
    tile_m = min(2048, cap_rows)
    # Keep >= 2 M-tiles when there is enough work (v7x megacore sharding).
    if m >= 256:
        tile_m = min(tile_m, _round_up(-(-m // 2), 128))
    tile_m = min(tile_m, _round_up(m, 16))
    # MXU / layout friendly granularity: multiples of 128 when possible, else 16.
    if tile_m >= 128:
        tile_m = (tile_m // 128) * 128
    else:
        tile_m = max(16, (tile_m // 16) * 16)
    return tile_m


def _linear_resident(x2d, a_t, budget):
    m, d = x2d.shape
    itemsize = jnp.dtype(x2d.dtype).itemsize
    at_bytes = jnp.dtype(a_t.dtype).itemsize * d * d
    tile_m = _choose_tile_m(m, d, itemsize, at_bytes, budget)
    vmem_limit = int(min(max(at_bytes + 4 * tile_m * d * itemsize + (2 << 20),
                             8 << 20), budget))
    return pl.pallas_call(
        linear_kernel,
        out_shape=jax.ShapeDtypeStruct((m, d), x2d.dtype),
        grid_spec=pltpu.PrefetchScalarGridSpec(
            num_scalar_prefetch=0,
            grid=(pl.cdiv(m, tile_m),),           # no padding: ragged last block masked
            in_specs=[
                pl.BlockSpec((tile_m, d), lambda i: (i, 0)),
                # Grid-invariant A^T: single-buffered, stays resident in VMEM.
                pl.BlockSpec((d, d), lambda i: (0, 0), pipeline_mode=pl.Buffered(1)),
            ],
            out_specs=pl.BlockSpec((tile_m, d), lambda i: (i, 0)),
        ),
        compiler_params=pltpu.CompilerParams(
            dimension_semantics=("parallel",),
            vmem_limit_bytes=vmem_limit,
        ),
    )(x2d, a_t)


def _linear_ktiled(x2d, a_t, budget):
    # Fallback for projector dims too large to keep A^T resident in VMEM.
    m, d = x2d.shape
    dtype = x2d.dtype
    itemsize = jnp.dtype(dtype).itemsize
    tm = min(256, _round_up(m, 16))
    tn = 512 if d >= 512 else _round_up(d, 128)
    tk = 512 if d >= 512 else _round_up(d, 128)
    # Zero-pad the contraction axis so partial K blocks never read garbage.
    kp = _round_up(d, tk)
    if kp != d:
        x2d = jnp.pad(x2d, ((0, 0), (0, kp - d)))
        a_t = jnp.pad(a_t, ((0, kp - d), (0, 0)))
    vmem_limit = int(min(max(
        2 * (tm * tk + tk * tn + tm * tn) * itemsize + tm * tn * 4 + (2 << 20),
        8 << 20), budget))
    return pl.pallas_call(
        matmul_tiled_kernel,
        out_shape=jax.ShapeDtypeStruct((m, d), dtype),
        grid_spec=pltpu.PrefetchScalarGridSpec(
            num_scalar_prefetch=0,
            grid=(pl.cdiv(m, tm), pl.cdiv(d, tn), kp // tk),
            in_specs=[
                pl.BlockSpec((tm, tk), lambda i, j, k: (i, k)),
                pl.BlockSpec((tk, tn), lambda i, j, k: (k, j)),
            ],
            out_specs=pl.BlockSpec((tm, tn), lambda i, j, k: (i, j)),
            scratch_shapes=[pltpu.VMEM((tm, tn), jnp.float32)],
        ),
        compiler_params=pltpu.CompilerParams(
            dimension_semantics=("parallel", "parallel", "arbitrary"),
            vmem_limit_bytes=vmem_limit,
        ),
    )(x2d, a_t)


def linear_pallas(x2d, a_t):
    m, d = x2d.shape
    itemsize = jnp.dtype(x2d.dtype).itemsize
    budget = _vmem_budget_bytes()
    at_bytes = jnp.dtype(a_t.dtype).itemsize * d * d
    min_tile = min(128, _round_up(max(m, 8), 16))
    min_needed = at_bytes + 4 * min_tile * d * itemsize + (2 << 20)
    if min_needed > budget:
        return _linear_ktiled(x2d, a_t, budget)
    return _linear_resident(x2d, a_t, budget)


# ----------------------------------------------------------------------------
# Module forward (glue in plain JAX; matmuls / expm in the kernels)
# ----------------------------------------------------------------------------
@jax.jit
def orthogonal_projector_forward(student_features, teacher_features, weight):
    # A = expm((W - W^T)/2) computed in fp32 then cast (mirrors matrix_exp(W.float())
    # .to(W.dtype)).  The kernel emits A^T already in weight.dtype so the hot loop is
    # a standard (M,K)x(K,N) matmul with no extra convert / transpose pass.
    a_t = expm_skew_t_pallas(weight, weight.dtype)

    orig_shape = student_features.shape
    d = orig_shape[-1]
    x2d = student_features.reshape(-1, d)
    if a_t.dtype != x2d.dtype:
        a_t = a_t.astype(x2d.dtype)
    proj = linear_pallas(x2d, a_t).reshape(orig_shape)
    return proj, teacher_features


if __name__ == "__main__":
    key = jax.random.PRNGKey(0)
    k_w, k_s, k_t = jax.random.split(key, 3)

    teacher_dim = 128   # projection weight is [teacher_dim, teacher_dim]
    student_dim = 128   # F.linear requires student last dim == teacher_dim
    batch, seq = 2, 8

    # Module initializes weight = eye(teacher_dim); add a small deterministic
    # perturbation so the matrix exponential / projection are exercised non-trivially.
    weight = jnp.eye(teacher_dim, dtype=jnp.float32) + \
        0.05 * jax.random.normal(k_w, (teacher_dim, teacher_dim), dtype=jnp.float32)

    student = jax.random.normal(k_s, (batch, seq, student_dim), dtype=jnp.float32)
    teacher = jax.random.normal(k_t, (batch, seq, teacher_dim), dtype=jnp.float32)

    proj, teacher_out = orthogonal_projector_forward(student, teacher, weight)
    jax.block_until_ready((proj, teacher_out))

    # Reference check (plain JAX).
    w_skew = (weight - weight.T) * 0.5
    a_ref = jax.scipy.linalg.expm(w_skew)
    proj_ref = jnp.einsum("bsd,od->bso", student, a_ref)

    np.testing.assert_allclose(np.asarray(proj), np.asarray(proj_ref), atol=2e-4, rtol=2e-4)
    np.testing.assert_array_equal(np.asarray(teacher_out), np.asarray(teacher))

    print("KERNEL_OK")
</pallas_src>

<mosaic_0001>
module attributes {stable_mosaic.version = 11 : i64} {
  func.func @linear_kernel(%arg0: i32, %arg1: memref<16x128xf32, #tpu.memory_space<vmem>>, %arg2: memref<128x128xf32, #tpu.memory_space<vmem>>, %arg3: memref<16x128xf32, #tpu.memory_space<vmem>>) attributes {dimension_semantics = [#tpu.dimension_semantics<parallel>], iteration_bounds = array<i64: 1>, scalar_prefetch = 0 : i64, scratch_operands = 0 : i64, tpu.core_type = #tpu.core_type<tc>, window_params = [{transform_indices = @transform_0, window_bounds = array<i64: 16, 128>}, {pipeline_mode = #tpu.pipeline_mode<synchronous>, transform_indices = @transform_1, window_bounds = array<i64: 128, 128>}, {transform_indices = @transform_2, window_bounds = array<i64: 16, 128>}]} {
    %c0 = arith.constant 0 : index
    %c0_0 = arith.constant 0 : index
    %0 = vector.load %arg1[%c0, %c0_0] : memref<16x128xf32, #tpu.memory_space<vmem>>, vector<16x128xf32>
    %c0_1 = arith.constant 0 : index
    %c0_2 = arith.constant 0 : index
    %1 = vector.load %arg2[%c0_1, %c0_2] : memref<128x128xf32, #tpu.memory_space<vmem>>, vector<128x128xf32>
    %cst = arith.constant dense<0.000000e+00> : vector<16x128xf32>
    %2 = tpu.matmul %0, %1, %cst {dimension_numbers = #tpu.dot_dimension_numbers<[1], [0], [0], [1], [0, 0, 1, 1], [], []>} : vector<16x128xf32>, vector<128x128xf32>, vector<16x128xf32> -> vector<16x128xf32>
    %c0_3 = arith.constant 0 : index
    %c0_4 = arith.constant 0 : index
    %3 = vector.load %arg3[%c0_3, %c0_4] : memref<16x128xf32, #tpu.memory_space<vmem>>, vector<16x128xf32>
    tpu.vector_store %arg3[%c0_3, %c0_4], %2 {strides = array<i32>} : memref<16x128xf32, #tpu.memory_space<vmem>>, vector<16x128xf32>,
    return
  }
  func.func @transform_0(%arg0: i32) -> (i32, i32) {
    %c0_i32 = arith.constant 0 : i32
    %c0_i32_0 = arith.constant 0 : i32
    return %arg0, %c0_i32 : i32, i32
  }
  func.func @transform_1(%arg0: i32) -> (i32, i32) {
    %c0_i32 = arith.constant 0 : i32
    %c0_i32_0 = arith.constant 0 : i32
    %c0_i32_1 = arith.constant 0 : i32
    return %c0_i32, %c0_i32_0 : i32, i32
  }
  func.func @transform_2(%arg0: i32) -> (i32, i32) {
    %c0_i32 = arith.constant 0 : i32
    %c0_i32_0 = arith.constant 0 : i32
    return %arg0, %c0_i32 : i32, i32
  }
}

module attributes {stable_mosaic.version = 11 : i64} {
  func.func @expm_t_kernel(%arg0: i32, %arg1: memref<128x128xf32, #tpu.memory_space<vmem>>, %arg2: memref<128x128xf32, #tpu.memory_space<vmem>>) attributes {dimension_semantics = [#tpu.dimension_semantics<arbitrary>], iteration_bounds = array<i64: 1>, scalar_prefetch = 0 : i64, scratch_operands = 0 : i64, tpu.core_type = #tpu.core_type<tc>, window_params = [{pipeline_mode = #tpu.pipeline_mode<synchronous>, transform_indices = @transform_0, window_bounds = array<i64: 128, 128>}, {pipeline_mode = #tpu.pipeline_mode<synchronous>, transform_indices = @transform_1, window_bounds = array<i64: 128, 128>}]} {
    %c0 = arith.constant 0 : index
    %c0_0 = arith.constant 0 : index
    %0 = vector.load %arg1[%c0, %c0_0] : memref<128x128xf32, #tpu.memory_space<vmem>>, vector<128x128xf32>
    %1 = tpu.transpose %0, [1, 0] : vector<128x128xf32> -> vector<128x128xf32>
    %2 = arith.subf %1, %0 : vector<128x128xf32>
    %cst = arith.constant 5.000000e-01 : f32
    %3 = vector.broadcast %cst : f32 to vector<128x128xf32>
    %4 = arith.mulf %2, %3 : vector<128x128xf32>
    %5 = math.absf %4 : vector<128x128xf32>
    %cst_1 = arith.constant dense<0.000000e+00> : vector<128xf32>
    %6 = vector.multi_reduction <add>, %5, %cst_1 [1] : vector<128x128xf32> to vector<128xf32>
    %7 = vector.shape_cast %6 : vector<128xf32> to vector<128x1xf32>
    %8 = vector.shape_cast %7 : vector<128x1xf32> to vector<1x128x1xf32>
    %cst_2 = arith.constant dense<0xFF800000> : vector<1xf32>
    %9 = vector.multi_reduction <maximumf>, %8, %cst_2 [1, 2] : vector<1x128x1xf32> to vector<1xf32>
    %10 = vector.shape_cast %9 : vector<1xf32> to vector<1x1x1xf32>
    %11 = vector.extract %10[0, 0, 0] : f32 from vector<1x1x1xf32>
    %cst_3 = arith.constant 1.000000e-30 : f32
    %12 = arith.maximumf %11, %cst_3 : f32
    %13 = math.log %12 : f32
    %cst_4 = arith.constant 2.000000e+00 : f32
    %14 = math.log %cst_4 : f32
    %15 = arith.divf %13, %14 : f32
    %16 = math.ceil %15 : f32
    %cst_5 = arith.constant 1.000000e+00 : f32
    %17 = arith.addf %16, %cst_5 : f32
    %cst_6 = arith.constant 0.000000e+00 : f32
    %cst_7 = arith.constant 1.200000e+01 : f32
    %18 = arith.maximumf %cst_6, %17 : f32
    %19 = arith.minimumf %cst_7, %18 : f32
    %20 = arith.fptosi %19 : f32 to i32
    %cst_8 = arith.constant 1.000000e+00 : f32
    %c0_i32 = arith.constant 0 : i32
    %c12_i32 = arith.constant 12 : i32
    %21 = arith.addi %c0_i32, %c12_i32 : i32
    %c1_i32 = arith.constant 1 : i32
    %22 = scf.for %arg3 = %c0_i32 to %21 step %c1_i32 iter_args(%arg4 = %cst_8) -> (f32)  : i32 {
      %76 = arith.cmpi slt, %arg3, %20 : i32
      %cst_34 = arith.constant 5.000000e-01 : f32
      %77 = arith.mulf %arg4, %cst_34 : f32
      %78 = arith.select %76, %77, %arg4 : f32
      scf.yield %78 : f32
    }
    %c12_i32_9 = arith.constant 12 : i32
    %23 = vector.broadcast %22 : f32 to vector<128x128xf32>
    %24 = arith.mulf %4, %23 : vector<128x128xf32>
    %25 = tpu.iota {dimensions = array<i32: 0>} : vector<128x128xi32>
    %26 = tpu.iota {dimensions = array<i32: 1>} : vector<128x128xi32>
    %27 = arith.cmpi eq, %25, %26 : vector<128x128xi32>
    %28 = arith.extui %27 : vector<128x128xi1> to vector<128x128xi32>
    %29 = arith.sitofp %28 : vector<128x128xi32> to vector<128x128xf32>
    %cst_10 = arith.constant dense<0.000000e+00> : vector<128x128xf32>
    %30 = tpu.matmul %24, %24, %cst_10 {dimension_numbers = #tpu.dot_dimension_numbers<[1], [0], [0], [1], [0, 0, 1, 1], [], []>} : vector<128x128xf32>, vector<128x128xf32>, vector<128x128xf32> -> vector<128x128xf32>
    %cst_11 = arith.constant dense<0.000000e+00> : vector<128x128xf32>
    %31 = tpu.matmul %30, %24, %cst_11 {dimension_numbers = #tpu.dot_dimension_numbers<[1], [0], [0], [1], [0, 0, 1, 1], [], []>} : vector<128x128xf32>, vector<128x128xf32>, vector<128x128xf32> -> vector<128x128xf32>
    %cst_12 = arith.constant dense<0.000000e+00> : vector<128x128xf32>
    %32 = tpu.matmul %30, %30, %cst_12 {dimension_numbers = #tpu.dot_dimension_numbers<[1], [0], [0], [1], [0, 0, 1, 1], [], []>} : vector<128x128xf32>, vector<128x128xf32>, vector<128x128xf32> -> vector<128x128xf32>
    %cst_13 = arith.constant 1.000000e+00 : f32
    %33 = vector.broadcast %cst_13 : f32 to vector<128x128xf32>
    %34 = arith.mulf %33, %29 : vector<128x128xf32>
    %cst_14 = arith.constant 1.000000e+00 : f32
    %35 = vector.broadcast %cst_14 : f32 to vector<128x128xf32>
    %36 = arith.mulf %35, %24 : vector<128x128xf32>
    %37 = arith.addf %34, %36 : vector<128x128xf32>
    %cst_15 = arith.constant 5.000000e-01 : f32
    %38 = vector.broadcast %cst_15 : f32 to vector<128x128xf32>
    %39 = arith.mulf %38, %30 : vector<128x128xf32>
    %40 = arith.addf %37, %39 : vector<128x128xf32>
    %cst_16 = arith.constant 0.166666672 : f32
    %41 = vector.broadcast %cst_16 : f32 to vector<128x128xf32>
    %42 = arith.mulf %41, %31 : vector<128x128xf32>
    %43 = arith.addf %40, %42 : vector<128x128xf32>
    %cst_17 = arith.constant 0.0416666679 : f32
    %44 = vector.broadcast %cst_17 : f32 to vector<128x128xf32>
    %45 = arith.mulf %44, %29 : vector<128x128xf32>
    %cst_18 = arith.constant 0.00833333377 : f32
    %46 = vector.broadcast %cst_18 : f32 to vector<128x128xf32>
    %47 = arith.mulf %46, %24 : vector<128x128xf32>
    %48 = arith.addf %45, %47 : vector<128x128xf32>
    %cst_19 = arith.constant 0.00138888892 : f32
    %49 = vector.broadcast %cst_19 : f32 to vector<128x128xf32>
    %50 = arith.mulf %49, %30 : vector<128x128xf32>
    %51 = arith.addf %48, %50 : vector<128x128xf32>
    %cst_20 = arith.constant 1.98412701E-4 : f32
    %52 = vector.broadcast %cst_20 : f32 to vector<128x128xf32>
    %53 = arith.mulf %52, %31 : vector<128x128xf32>
    %54 = arith.addf %51, %53 : vector<128x128xf32>
    %cst_21 = arith.constant 2.48015876E-5 : f32
    %55 = vector.broadcast %cst_21 : f32 to vector<128x128xf32>
    %56 = arith.mulf %55, %29 : vector<128x128xf32>
    %cst_22 = arith.constant 2.75573188E-6 : f32
    %57 = vector.broadcast %cst_22 : f32 to vector<128x128xf32>
    %58 = arith.mulf %57, %24 : vector<128x128xf32>
    %59 = arith.addf %56, %58 : vector<128x128xf32>
    %cst_23 = arith.constant 2.755732E-7 : f32
    %60 = vector.broadcast %cst_23 : f32 to vector<128x128xf32>
    %61 = arith.mulf %60, %30 : vector<128x128xf32>
    %62 = arith.addf %59, %61 : vector<128x128xf32>
    %cst_24 = arith.constant 2.50521079E-8 : f32
    %63 = vector.broadcast %cst_24 : f32 to vector<128x128xf32>
    %64 = arith.mulf %63, %31 : vector<128x128xf32>
    %65 = arith.addf %62, %64 : vector<128x128xf32>
    %cst_25 = arith.constant 2.08767559E-9 : f32
    %66 = vector.broadcast %cst_25 : f32 to vector<128x128xf32>
    %67 = arith.mulf %66, %32 : vector<128x128xf32>
    %68 = arith.addf %65, %67 : vector<128x128xf32>
    %cst_26 = arith.constant dense<0.000000e+00> : vector<128x128xf32>
    %69 = tpu.matmul %32, %68, %cst_26 {dimension_numbers = #tpu.dot_dimension_numbers<[1], [0], [0], [1], [0, 0, 1, 1], [], []>} : vector<128x128xf32>, vector<128x128xf32>, vector<128x128xf32> -> vector<128x128xf32>
    %70 = arith.addf %54, %69 : vector<128x128xf32>
    %cst_27 = arith.constant dense<0.000000e+00> : vector<128x128xf32>
    %71 = tpu.matmul %32, %70, %cst_27 {dimension_numbers = #tpu.dot_dimension_numbers<[1], [0], [0], [1], [0, 0, 1, 1], [], []>} : vector<128x128xf32>, vector<128x128xf32>, vector<128x128xf32> -> vector<128x128xf32>
    %72 = arith.addf %43, %71 : vector<128x128xf32>
    %c0_i32_28 = arith.constant 0 : i32
    %c12_i32_29 = arith.constant 12 : i32
    %73 = arith.addi %c0_i32_28, %c12_i32_29 : i32
    %c1_i32_30 = arith.constant 1 : i32
    %74 = scf.for %arg3 = %c0_i32_28 to %73 step %c1_i32_30 iter_args(%arg4 = %72) -> (vector<128x128xf32>)  : i32 {
      %76 = arith.cmpi slt, %arg3, %20 : i32
      %cst_34 = arith.constant dense<0.000000e+00> : vector<128x128xf32>
      %77 = tpu.matmul %arg4, %arg4, %cst_34 {dimension_numbers = #tpu.dot_dimension_numbers<[1], [0], [0], [1], [0, 0, 1, 1], [], []>} : vector<128x128xf32>, vector<128x128xf32>, vector<128x128xf32> -> vector<128x128xf32>
      %78 = arith.select %76, %77, %arg4 : vector<128x128xf32>
      scf.yield %78 : vector<128x128xf32>
    }
    %c12_i32_31 = arith.constant 12 : i32
    %c0_32 = arith.constant 0 : index
    %c0_33 = arith.constant 0 : index
    %75 = vector.load %arg2[%c0_32, %c0_33] : memref<128x128xf32, #tpu.memory_space<vmem>>, vector<128x128xf32>
    tpu.vector_store %arg2[%c0_32, %c0_33], %74 {strides = array<i32>} : memref<128x128xf32, #tpu.memory_space<vmem>>, vector<128x128xf32>,
    return
  }
  func.func @transform_0(%arg0: i32) -> (i32, i32) {
    %c0_i32 = arith.constant 0 : i32
    %c0_i32_0 = arith.constant 0 : i32
    %c0_i32_1 = arith.constant 0 : i32
    return %c0_i32, %c0_i32_0 : i32, i32
  }
  func.func @transform_1(%arg0: i32) -> (i32, i32) {
    %c0_i32 = arith.constant 0 : i32
    %c0_i32_0 = arith.constant 0 : i32
    %c0_i32_1 = arith.constant 0 : i32
    return %c0_i32, %c0_i32_0 : i32, i32
  }
}

</mosaic_0001>

<bundles_post_ra>
// kernel: orthogonal_projector_forward.3
= control target key start
LH: loop header
LB: loop body
LE: loop exit
PB: predicated region body
PF: predicated region fallthrough
CT: control target
= control target key end

     0   :  { %s319_s0 = inlined_call_operand.vmem [shape: f32[16,128], index: 0, kind: input, shape index: {}]   ;;  %s320_s1 = inlined_call_operand.vmem [shape: f32[128,128], index: 1, kind: input, shape index: {}]   ;;  %s321_s2 = inlined_call_operand.hbm [shape: f32[16,128], index: 2, kind: output, shape index: {}]  }
   0x1   :  { %v14_v0 = vld [vmem:[%s320_s1] sm:$0xff]  ;;  %v15_v1 = vld [vmem:[%s320_s1 + $0x8] sm:$0xff]  ;;  %v16_v2 = vld [vmem:[%s320_s1 + $0x10] sm:$0xff] }
   0x2   :  { %v176_v3 = vpack.c.bf16 %v15_v1, %v14_v0  ;;  %v17_v4 = vld [vmem:[%s320_s1 + $0x18] sm:$0xff]  ;;  %v18_v6 = vld [vmem:[%s320_s1 + $0x20] sm:$0xff]  ;;  %v19_v7 = vld [vmem:[%s320_s1 + $0x28] sm:$0xff] }
   0x3   :  { %v180_v5 = vpack.c.bf16 %v17_v4, %v16_v2  ;;  %v184_v8 = vpack.c.bf16 %v19_v7, %v18_v6  ;;  %v12_v9 = vld [vmem:[%s319_s0] sm:$0xff]  ;;  %v20_v10 = vld [vmem:[%s320_s1 + $0x30] sm:$0xff]  ;;  %v21_v11 = vld [vmem:[%s320_s1 + $0x38] sm:$0xff] }
   0x4   :  { %177 = vmatprep.subr.bf16.mxu0 %v176_v3  ;;  %173 = vmatprep.mubr.f32.mxu0 %v12_v9 }
   0x5   :  { %179 = vmatpush3.bf16.msra.mxu0 %v176_v3 }
   0x6   :  { %181 = vmatprep.subr.bf16.mxu0 %v180_v5 }
   0x7   :  { %7 = vsyncpa [#allocation3], 0  ;;  %v188_v12 = vpack.c.bf16 %v21_v11, %v20_v10  ;;  %v22_v13 = vld [vmem:[%s320_s1 + $0x40] sm:$0xff]  ;;  %v23_v14 = vld [vmem:[%s320_s1 + $0x48] sm:$0xff]  ;;  %s235_s17 = smov [#allocation2]  }
   0x8   :  { %v192_v15 = vpack.c.bf16 %v23_v14, %v22_v13  ;;  %v24_v16 = vld [vmem:[%s320_s1 + $0x50] sm:$0xff]  ;;  %v25_v17 = vld [vmem:[%s320_s1 + $0x58] sm:$0xff]  ;;  %v26_v19 = vld [vmem:[%s320_s1 + $0x60] sm:$0xff]  ;;  %s112_s18 = sshll.u32 %s235_s17, 4  ;;  %s113_s18 = int_to_ptr.vmem [resolvable:$true] %s112_s18 }
   0x9   :  { %183 = vmatpush3.bf16.msra.mxu0 %v180_v5  ;;  %v196_v18 = vpack.c.bf16 %v25_v17, %v24_v16  ;;  %v27_v20 = vld [vmem:[%s320_s1 + $0x68] sm:$0xff]  ;;  %v28_v22 = vld [vmem:[%s320_s1 + $0x70] sm:$0xff]  ;;  %v29_v23 = vld [vmem:[%s320_s1 + $0x78] sm:$0xff]  ;;  %s211_s19 = scalar_lea.vmem %s113_s18, 256  ;;  %p216_p1 = scmp.lt.s32.totalorder %s113_s18, %s113_s18 }
   0xa   :  { %185 = vmatprep.subr.bf16.mxu0 %v184_v8  ;;  %v200_v21 = vpack.c.bf16 %v27_v20, %v26_v19  ;;  %v204_v24 = vpack.c.bf16 %v29_v23, %v28_v22  ;;  %v13_v25 = vld [vmem:[%s319_s0 + $0x8] sm:$0xff]  ;;  %p212_p0 = scmp.ne.s32.totalorder %s113_s18, %s211_s19  ;;  %p217_p2 = scmp.lt.s32.totalorder %s211_s19, %s211_s19 }
   0xc   :  { %p218_p3 = por %p217_p2, %p216_p1 }
   0xd   :  { %187 = vmatpush3.bf16.msra.mxu0 %v184_v8 }
   0xe   :  { %189 = vmatprep.subr.bf16.mxu0 %v188_v12  ;;  %p219_p4 = pnand %p218_p3, %p212_p0 }
  0x11   :  { %191 = vmatpush3.bf16.msra.mxu0 %v188_v12 }
  0x12   :  { %193 = vmatprep.subr.bf16.mxu0 %v192_v15 }
  0x15   :  { %195 = vmatpush3.bf16.msra.mxu0 %v192_v15 }
  0x16   :  { %197 = vmatprep.subr.bf16.mxu0 %v196_v18 }
  0x19   :  { %199 = vmatpush3.bf16.msra.mxu0 %v196_v18 }
  0x1a   :  { %201 = vmatprep.subr.bf16.mxu0 %v200_v21 }
  0x1d   :  { %203 = vmatpush3.bf16.msra.mxu0 %v200_v21 }
  0x1e   :  { %205 = vmatprep.subr.bf16.mxu0 %v204_v24 }
  0x21   :  { %207 = vmatpush3.bf16.msra.mxu0 %v204_v24 }
  0x24   :  { %174 = vmatmul.mubr.f32.vlgmr.msra.gmra.mrb[0].mxu0 %v13_v25 }
  0xf7   :  { %v175_v26 = vpop.f32.mrb[0].mxu0 }
  0xf8   :  { %106 = vst [vmem:[#allocation2 + $0x8] sm:$0xff] %v175_v26  ;;  %v96_v27 = vpop.f32.mrb[1].mxu0 }
  0xf9   :  { %105 = vst [vmem:[#allocation2] sm:$0xff] %v96_v27 }
  0xfa   :  { %222 = shalt.err (!%p219_p4)
}
  0xfb   :  { %s223_s21 = scalar_lea.hbm %s321_s2, 256 }
  0xfc   :  { %p224_p5 = scmp.ne.s32.totalorder %s321_s2, %s223_s21  ;;  %p227_p6 = scmp.lt.u32.totalorder %s223_s21, %s321_s2 }
  0xfe   :  { %p229_p7 = pnand %p227_p6, %p224_p5 }
 0x100   :  { %232 = shalt.err (!%p229_p7)
}
 0x101   :  { %s236_s25 = smov 128   ;;  %s237_s26 = smov 8  }
 0x102   :  { %118 = dma.vmem_to_hbm [thread:$0]  %s113_s18, 256, %s321_s2, [#allocation3], %s236_s25, %s236_s25, %s237_s26  }
 0x103   :  { %233 = dma.done.wait [#allocation3], 256  }
 0x104   :  { %234 = vsyncadd [#allocation3], 4294967040 }
 0x105   :  { %122 = vsyncpa [#allocation3], 1 }

// kernel: orthogonal_projector_forward.2
= control target key start
LH: loop header
LB: loop body
LE: loop exit
PB: predicated region body
PF: predicated region fallthrough
CT: control target
= control target key end

     0   :  { %6 = vsyncpa [#allocation3], 0  ;;  %s2755_s6 = smov [#allocation2]   ;;  %s3842_s0 = inlined_call_operand.hbm [shape: f32[128,128], index: 0, kind: input, shape index: {}]   ;;  %s3843_s1 = inlined_call_operand.vmem [shape: f32[128,128], index: 1, kind: output, shape index: {}]  }
   0x1   :  { %s12_s7 = sshll.u32 %s2755_s6, 4  ;;  %s2579_s10 = scalar_lea.hbm %s3842_s0, 2048  ;;  %s13_s7 = int_to_ptr.vmem [resolvable:$true] %s12_s7 }
   0x2   :  { %p2580_p0 = scmp.ne.s32.totalorder %s3842_s0, %s2579_s10  ;;  %p2583_p1 = scmp.lt.u32.totalorder %s2579_s10, %s3842_s0 }
   0x4   :  { %p2585_p2 = pnand %p2583_p1, %p2580_p0 }
   0x6   :  { %2588 = shalt.err (!%p2585_p2)
}
   0x7   :  { %s2589_s15 = scalar_lea.vmem %s13_s7, 2048  ;;  %p2594_p4 = scmp.lt.s32.totalorder %s13_s7, %s13_s7 }
   0x8   :  { %p2590_p3 = scmp.ne.s32.totalorder %s13_s7, %s2589_s15  ;;  %p2595_p5 = scmp.lt.s32.totalorder %s2589_s15, %s2589_s15 }
   0xa   :  { %p2596_p6 = por %p2595_p5, %p2594_p4 }
   0xc   :  { %p2597_p7 = pnand %p2596_p6, %p2590_p3 }
   0xe   :  { %2600 = shalt.err (!%p2597_p7)
}
   0xf   :  { %s2756_s16 = smov 128   ;;  %s2757_s17 = smov 8  }
  0x10   :  { %18 = dma.hbm_to_vmem [thread:$0]  %s3842_s0, 2048, %s13_s7, [#allocation3], %s2756_s16, %s2756_s16, %s2757_s17  }
  0x11   :  { %2677 = dma.done.wait [#allocation3], 2048  }
  0x12   :  { %2678 = vsyncadd [#allocation3], 4294965248  ;;  %v22_v0 = vld [vmem:[#allocation2] sm:$0xff]  ;;  %v23_v1 = vld [vmem:[#allocation2 + $0x8] sm:$0xff]  ;;  %s2758_s20 = smov 1e-30  }
  0x13   :  { %38 = vxpose.xlu0.b32.start [1/16] %v22_v0, 128  ;;  %v24_v2 = vld [vmem:[#allocation2 + $0x10] sm:$0xff]  ;;  %v25_v3 = vld [vmem:[#allocation2 + $0x18] sm:$0xff]  ;;  %v26_v4 = vld [vmem:[#allocation2 + $0x20] sm:$0xff]  ;;  %s2759_s26 = smov 0.0   ;;  %s2760_s28 = smov 12.0  }
  0x14   :  { %v27_v5 = vld [vmem:[#allocation2 + $0x28] sm:$0xff]  ;;  %v28_v6 = vld [vmem:[#allocation2 + $0x30] sm:$0xff]  ;;  %v29_v7 = vld [vmem:[#allocation2 + $0x38] sm:$0xff]  ;;  %s2679_s4 = smov 1.0   ;;  %s2683_s5 = smov 0  }
  0x15   :  { %v30_v8 = vld [vmem:[#allocation2 + $0x40] sm:$0xff]  ;;  %v31_v9 = vld [vmem:[#allocation2 + $0x48] sm:$0xff]  ;;  %v2784_v10 = vld [vmem:[#allocation2 + $0x50] sm:$0xff] }
  0x16   :  { %v2787_v11 = vld [vmem:[#allocation2 + $0x58] sm:$0xff]  ;;  %v2790_v12 = vld [vmem:[#allocation2 + $0x60] sm:$0xff]  ;;  %v2793_v13 = vld [vmem:[#allocation2 + $0x68] sm:$0xff] }
  0x17   :  { %39 = vxpose.xlu0.b32.cont [2/16] %v23_v1, 128  ;;  %v2796_v14 = vld [vmem:[#allocation2 + $0x70] sm:$0xff]  ;;  %v2799_v15 = vld [vmem:[#allocation2 + $0x78] sm:$0xff] }
  0x1b   :  { %40 = vxpose.xlu0.b32.cont [3/16] %v24_v2, 128 }
  0x1f   :  { %41 = vxpose.xlu0.b32.cont [4/16] %v25_v3, 128 }
  0x23   :  { %42 = vxpose.xlu0.b32.cont [5/16] %v26_v4, 128 }
  0x27   :  { %43 = vxpose.xlu0.b32.cont [6/16] %v27_v5, 128 }
  0x2b   :  { %44 = vxpose.xlu0.b32.cont [7/16] %v28_v6, 128 }
  0x2f   :  { %45 = vxpose.xlu0.b32.cont [8/16] %v29_v7, 128 }
  0x33   :  { %46 = vxpose.xlu0.b32.cont [9/16] %v30_v8, 128 }
  0x37   :  { %47 = vxpose.xlu0.b32.cont [10/16] %v31_v9, 128 }
  0x3b   :  { %48 = vxpose.xlu0.b32.cont [11/16] %v2784_v10, 128 }
  0x3f   :  { %49 = vxpose.xlu0.b32.cont [12/16] %v2787_v11, 128 }
  0x43   :  { %50 = vxpose.xlu0.b32.cont [13/16] %v2790_v12, 128 }
  0x47   :  { %51 = vxpose.xlu0.b32.cont [14/16] %v2793_v13, 128 }
  0x4b   :  { %52 = vxpose.xlu0.b32.cont [15/16] %v2796_v14, 128 }
  0x4f   :  { %53 = vxpose.xlu0.b32.end [16/16] %v2799_v15, 128 }
  0x93   :  { %v54_v16 = vpop.trf.xlu0 }
  0x94   :  { %v70_v17 = vsub.f32 %v54_v16, %v22_v0 }
  0x96   :  { %v2802_v18 = vmul.f32 0.5, %v70_v17 }
  0x97   :  { %v55_v19 = vpop.trf.xlu0 }
  0x98   :  { %v71_v20 = vsub.f32 %v55_v19, %v23_v1  ;;  %v102_v21 = vand.u32 2147483647, %v2802_v18 }
  0x9a   :  { %v2805_v22 = vmul.f32 0.5, %v71_v20  ;;  %118 = vadd.xlane.f32.xlu1 %v102_v21 }
  0x9b   :  { %v56_v23 = vpop.trf.xlu0 }
  0x9c   :  { %v72_v24 = vsub.f32 %v56_v23, %v24_v2  ;;  %v103_v25 = vand.u32 2147483647, %v2805_v22 }
  0x9e   :  { %v2808_v26 = vmul.f32 0.5, %v72_v24  ;;  %120 = vadd.xlane.f32.xlu1 %v103_v25 }
  0x9f   :  { %v57_v27 = vpop.trf.xlu0 }
  0xa0   :  { %v73_v28 = vsub.f32 %v57_v27, %v25_v3  ;;  %v104_v29 = vand.u32 2147483647, %v2808_v26 }
  0xa2   :  { %v2811_v30 = vmul.f32 0.5, %v73_v28  ;;  %122 = vadd.xlane.f32.xlu1 %v104_v29 }
  0xa3   :  { %v58_v31 = vpop.trf.xlu0 }
  0xa4   :  { %v74_v32 = vsub.f32 %v58_v31, %v26_v4  ;;  %v105_v33 = vand.u32 2147483647, %v2811_v30 }
  0xa6   :  { %v2814_v34 = vmul.f32 0.5, %v74_v32  ;;  %124 = vadd.xlane.f32.xlu1 %v105_v33 }
  0xa7   :  { %v59_v35 = vpop.trf.xlu0 }
  0xa8   :  { %v75_v36 = vsub.f32 %v59_v35, %v27_v5  ;;  %v106_v37 = vand.u32 2147483647, %v2814_v34 }
  0xaa   :  { %v2817_v38 = vmul.f32 0.5, %v75_v36  ;;  %126 = vadd.xlane.f32.xlu1 %v106_v37 }
  0xab   :  { %v60_v39 = vpop.trf.xlu0 }
  0xac   :  { %v76_v40 = vsub.f32 %v60_v39, %v28_v6  ;;  %v107_v41 = vand.u32 2147483647, %v2817_v38 }
  0xae   :  { %v2820_v42 = vmul.f32 0.5, %v76_v40  ;;  %128 = vadd.xlane.f32.xlu1 %v107_v41 }
  0xaf   :  { %v61_v43 = vpop.trf.xlu0 }
  0xb0   :  { %v77_v44 = vsub.f32 %v61_v43, %v29_v7  ;;  %v108_v45 = vand.u32 2147483647, %v2820_v42 }
  0xb2   :  { %v2823_v46 = vmul.f32 0.5, %v77_v44  ;;  %130 = vadd.xlane.f32.xlu1 %v108_v45 }
  0xb3   :  { %v62_v47 = vpop.trf.xlu0 }
  0xb4   :  { %v78_v48 = vsub.f32 %v62_v47, %v30_v8  ;;  %v109_v49 = vand.u32 2147483647, %v2823_v46 }
  0xb6   :  { %v2826_v50 = vmul.f32 0.5, %v78_v48  ;;  %132 = vadd.xlane.f32.xlu1 %v109_v49 }
  0xb7   :  { %v63_v51 = vpop.trf.xlu0 }
  0xb8   :  { %v79_v52 = vsub.f32 %v63_v51, %v31_v9  ;;  %v110_v53 = vand.u32 2147483647, %v2826_v50 }
  0xba   :  { %v2829_v54 = vmul.f32 0.5, %v79_v52  ;;  %134 = vadd.xlane.f32.xlu1 %v110_v53 }
  0xbb   :  { %v64_v55 = vpop.trf.xlu0 }
  0xbc   :  { %v80_v56 = vsub.f32 %v64_v55, %v2784_v10  ;;  %v111_v57 = vand.u32 2147483647, %v2829_v54 }
  0xbe   :  { %v2833_v58 = vmul.f32 0.5, %v80_v56  ;;  %136 = vadd.xlane.f32.xlu1 %v111_v57 }
  0xbf   :  { %v65_v59 = vpop.trf.xlu0 }
  0xc0   :  { %v81_v60 = vsub.f32 %v65_v59, %v2787_v11  ;;  %v112_v61 = vand.u32 2147483647, %v2833_v58 }
  0xc2   :  { %v2837_v62 = vmul.f32 0.5, %v81_v60  ;;  %138 = vadd.xlane.f32.xlu1 %v112_v61 }
  0xc3   :  { %v66_v63 = vpop.trf.xlu0 }
  0xc4   :  { %v82_v0 = vsub.f32 %v66_v63, %v2790_v12  ;;  %v113_v1 = vand.u32 2147483647, %v2837_v62 }
  0xc6   :  { %v2841_v2 = vmul.f32 0.5, %v82_v0  ;;  %140 = vadd.xlane.f32.xlu1 %v113_v1 }
  0xc7   :  { %v67_v3 = vpop.trf.xlu0 }
  0xc8   :  { %v83_v4 = vsub.f32 %v67_v3, %v2793_v13  ;;  %v114_v5 = vand.u32 2147483647, %v2841_v2 }
  0xca   :  { %v2845_v6 = vmul.f32 0.5, %v83_v4  ;;  %142 = vadd.xlane.f32.xlu1 %v114_v5 }
  0xcb   :  { %v68_v7 = vpop.trf.xlu0 }
  0xcc   :  { %v84_v8 = vsub.f32 %v68_v7, %v2796_v14  ;;  %v115_v9 = vand.u32 2147483647, %v2845_v6 }
  0xce   :  { %v2849_v10 = vmul.f32 0.5, %v84_v8  ;;  %144 = vadd.xlane.f32.xlu1 %v115_v9 }
  0xcf   :  { %v69_v11 = vpop.trf.xlu0 }
  0xd0   :  { %v85_v12 = vsub.f32 %v69_v11, %v2799_v15  ;;  %v116_v16 = vand.u32 2147483647, %v2849_v10 }
  0xd2   :  { %v2853_v17 = vmul.f32 0.5, %v85_v12  ;;  %146 = vadd.xlane.f32.xlu1 %v116_v16 }
  0xd4   :  { %v117_v13 = vand.u32 2147483647, %v2853_v17 }
  0xd6   :  { %148 = vadd.xlane.f32.xlu1 %v117_v13 }
 0x127   :  { %v119_v19 = vpop.xlane.xlu1 %118 }
 0x12b   :  { %v121_v20 = vpop.xlane.xlu1 %120 }
 0x12f   :  { %v123_v21 = vpop.xlane.xlu1 %122 }
 0x133   :  { %v125_v14 = vpop.xlane.xlu1 %124 }
 0x137   :  { %v127_v23 = vpop.xlane.xlu1 %126 }
 0x138   :  { %v150_v37 = vmax.f32 %v119_v19, %v127_v23 }
 0x13b   :  { %v129_v24 = vpop.xlane.xlu1 %128 }
 0x13c   :  { %v151_v35 = vmax.f32 %v121_v20, %v129_v24 }
 0x13f   :  { %v131_v25 = vpop.xlane.xlu1 %130 }
 0x140   :  { %v152_v39 = vmax.f32 %v123_v21, %v131_v25 }
 0x143   :  { %v133_v27 = vpop.xlane.xlu1 %132 }
 0x144   :  { %v153_v40 = vmax.f32 %v125_v14, %v133_v27 }
 0x147   :  { %v135_v28 = vpop.xlane.xlu1 %134 }
 0x148   :  { %v154_v43 = vmax.f32 %v150_v37, %v135_v28 }
 0x14b   :  { %v137_v29 = vpop.xlane.xlu1 %136 }
 0x14c   :  { %v155_v41 = vmax.f32 %v151_v35, %v137_v29 }
 0x14f   :  { %v139_v31 = vpop.xlane.xlu1 %138 }
 0x150   :  { %v156_v44 = vmax.f32 %v152_v39, %v139_v31 }
 0x153   :  { %v141_v15 = vpop.xlane.xlu1 %140 }
 0x154   :  { %v157_v45 = vmax.f32 %v153_v40, %v141_v15 }
 0x157   :  { %v143_v32 = vpop.xlane.xlu1 %142 }
 0x158   :  { %v158_v49 = vmax.f32 %v154_v43, %v143_v32 }
 0x15b   :  { %v145_v33 = vpop.xlane.xlu1 %144 }
 0x15c   :  { %v159_v47 = vmax.f32 %v155_v41, %v145_v33 }
 0x15e   :  { %v162_v53 = vmax.f32 %v158_v49, %v159_v47 }
 0x15f   :  { %v147_v36 = vpop.xlane.xlu1 %146 }
 0x160   :  { %v160_v51 = vmax.f32 %v156_v44, %v147_v36 }
 0x163   :  { %v149_v48 = vpop.xlane.xlu1 %148 }
 0x164   :  { %v161_v52 = vmax.f32 %v157_v45, %v149_v48 }
 0x166   :  { %v163_v55 = vmax.f32 %v160_v51, %v161_v52 }
 0x168   :  { %v164_v56 = vmax.f32 %v162_v53, %v163_v55 }
 0x16a   :  { %v165_v57 = vrot.slane %v164_v56, 4 }
 0x16c   :  { %v166_v59 = vmax.f32 %v164_v56, %v165_v57 }
 0x16e   :  { %v167_v60 = vrot.slane %v166_v59, 2 }
 0x170   :  { %v168_v61 = vmax.f32 %v166_v59, %v167_v60 }
 0x172   :  { %v169_v63 = vrot.slane %v168_v61, 1 }
 0x174   :  { %v170_v0 = vmax.f32 %v168_v61, %v169_v63 }
 0x176   :  { %2409 = vpush %v170_v0 }
 0x1a7   :  { %s2410_s0 = spop %2409 }
 0x1a8   :  { %s172_s21 = smax.f32 %s2758_s20, %s2410_s0 }
 0x1a9   :  { %v173_v1 = vstv %s172_s21 }
 0x1aa   :  { %2577 = vlog2.f32 %v173_v1 }
 0x1b4   :  { %v2578_v3 = vpop.eup %2577 }
 0x1b5   :  { %v175_v4 = vmul.f32 0.6931472, %v2578_v3 }
 0x1b7   :  { %2411 = vpush %v175_v4 }
 0x1e8   :  { %s2412_s22 = spop %2411 }
 0x1e9   :  { %s179_s23 = smul.f32 1.442695, %s2412_s22 }
 0x1eb   :  { %s180_s24 = sceil.f32 %s179_s23 }
 0x1ec   :  { %s181_s25 = sadd.f32 1.0, %s180_s24 }
 0x1ee   :  { %s182_s27 = smax.f32 %s2759_s26, %s181_s25 }
 0x1ef   :  { %s183_s29 = smin.f32 %s2760_s28, %s182_s27 }
 0x1f0   :  { %p2413_p8 = scmp.lt.s32.totalorder %s183_s29, 0  ;;  %s2414_s30 = sceil.f32 %s183_s29 }
 0x1f1   :  { %s2415_s2 = sfloor.f32 %s183_s29 }
 0x1f2   :  { %s3933_s30 = smov (!%p2413_p8, %s2414_s30), %s2415_s2 }
 0x1f3   :  { %s2417_s3 = scvt.f32.s32 %s3933_s30 }
 0x1f4 LB: > { %s193_s6 = smul.f32 0.5, %s2681_s4  ;;  %s2685_s5 = sphi %s2683_s5, %s190_s5   ;;  %s2681_s4 = sphi %s2679_s4, %s2680_s4  }
 0x1f5   : > { %p192_p9 = scmp.lt.s32.totalorder %s2685_s5, %s2417_s3  ;;  %s190_s5 = sadd.s32 1, %s2685_s5  }
 0x1f6   : > { %p187_p10 = scmp.ge.s32.totalorder %s190_s5, 12  }
 0x1f7   : > { %s3935_s6 = smov (!%p192_p9, %s193_s6), %s2681_s4  ;;  %v2761_v25 = vmov (%p187_p10), 0.0   ;;  %s3633_s7 = smov (%p187_p10), 0  }
 0x1f8   : > { %s2680_s4 = smov %s3935_s6   ;;  %189 = sbr.rel (!%p187_p10) target bundleno = 500 (0x1f4), region = 42  ;;  %v195_v5 = vstv (%p187_p10), %s3935_s6 }
 0x1f9   :  { %v2862_v7 = vmul.f32 (%p187_p10), %v195_v5, %v2802_v18  ;;  %v2865_v8 = vmul.f32 (%p187_p10), %v195_v5, %v2805_v22  ;;  %v2868_v9 = vmul.f32 (%p187_p10), %v195_v5, %v2808_v26  ;;  %v2871_v11 = vmul.f32 (%p187_p10), %v195_v5, %v2811_v30 }
 0x1fa   :  { %v2878_v13 = vmul.f32 (%p187_p10), %v195_v5, %v2814_v34  ;;  %v2881_v18 = vmul.f32 (%p187_p10), %v195_v5, %v2817_v38  ;;  %v2887_v26 = vmul.f32 (%p187_p10), %v195_v5, %v2820_v42  ;;  %v2890_v30 = vmul.f32 (%p187_p10), %v195_v5, %v2823_v46 }
 0x1fb   :  { %v2185_v12 = vpack.c.bf16 (%p187_p10), %v2865_v8, %v2862_v7  ;;  %v2189_v16 = vpack.c.bf16 (%p187_p10), %v2871_v11, %v2868_v9  ;;  %1881 = vmatprep.mubr.f32.mxu0 (%p187_p10), %v2862_v7  ;;  %v2895_v38 = vmul.f32 (%p187_p10), %v195_v5, %v2826_v50  ;;  %v2898_v19 = vmul.f32 (%p187_p10), %v195_v5, %v2829_v54 }
 0x1fc   :  { %v2193_v22 = vpack.c.bf16 (%p187_p10), %v2881_v18, %v2878_v13  ;;  %v2197_v34 = vpack.c.bf16 (%p187_p10), %v2890_v30, %v2887_v26  ;;  %v2903_v46 = vmul.f32 (%p187_p10), %v195_v5, %v2833_v58  ;;  %v2906_v20 = vmul.f32 (%p187_p10), %v195_v5, %v2837_v62 }
 0x1fd   :  { %2186 = vmatprep.subr.bf16.mxu0 (%p187_p10), %v2185_v12  ;;  %2218 = vmatprep.subr.bf16.mxu1 (%p187_p10), %v2185_v12  ;;  %3849 = vst [vmem:[#allocation5_spill] sm:$0xff] (%p187_p10), %v2898_v19  ;;  %v2201_v42 = vpack.c.bf16 (%p187_p10), %v2898_v19, %v2895_v38  ;;  %v2911_v54 = vmul.f32 (%p187_p10), %v195_v5, %v2841_v2  ;;  %v811_v33 = vmul.f32 (%p187_p10), 0.008333334, %v2865_v8  ;;  %v810_v45 = vmul.f32 (%p187_p10), 0.008333334, %v2862_v7 }
 0x1fe   :  { %2188 = vmatpush3.bf16.msra.mxu0 (%p187_p10), %v2185_v12  ;;  %2220 = vmatpush3.bf16.msra.mxu1 (%p187_p10), %v2185_v12  ;;  %3850 = vst [vmem:[#allocation6_spill] sm:$0xff] (%p187_p10), %v2903_v46  ;;  %v2205_v50 = vpack.c.bf16 (%p187_p10), %v2906_v20, %v2903_v46  ;;  %v2914_v21 = vmul.f32 (%p187_p10), %v195_v5, %v2845_v6  ;;  %v212_v6 = vlaneseq (%p187_p10)  ;;  %v813_v51 = vmul.f32 (%p187_p10), 0.008333334, %v2871_v11 }
 0x1ff   :  { %2190 = vmatprep.subr.bf16.mxu0 %v2189_v16  ;;  %2222 = vmatprep.subr.bf16.mxu1 %v2189_v16  ;;  %3851 = vst [vmem:[#allocation7_spill] sm:$0xff] %v2911_v54  ;;  %v2919_v62 = vmul.f32 %v195_v5, %v2849_v10  ;;  %v2922_v14 = vmul.f32 %v195_v5, %v2853_v17  ;;  %v812_v59 = vmul.f32 0.008333334, %v2868_v9  ;;  %v815_v61 = vmul.f32 0.008333334, %v2881_v18 }
 0x200   :  { %v2209_v58 = vpack.c.bf16 %v2914_v21, %v2911_v54  ;;  %v2941_v10 = vshrl.u32 %v212_v6, 7  ;;  %v2944_v23 = vand.u32 127, %v212_v6  ;;  %v814_v0 = vmul.f32 0.008333334, %v2878_v13 }
 0x201   :  { %v2213_v2 = vpack.c.bf16 %v2922_v14, %v2919_v62  ;;  %v817_v3 = vmul.f32 0.008333334, %v2890_v30 }
 0x202   :  { %2192 = vmatpush3.bf16.msra.mxu0 %v2189_v16  ;;  %2224 = vmatpush3.bf16.msra.mxu1 %v2189_v16  ;;  %v214_v17 = vadd.s32 8, %v2941_v10  ;;  %v216_v24 = vadd.s32 24, %v2941_v10  ;;  %v215_v28 = vadd.s32 16, %v2941_v10  ;;  %v218_v29 = vadd.s32 40, %v2941_v10 }
 0x203   :  { %2194 = vmatprep.subr.bf16.mxu0 %v2193_v22  ;;  %2226 = vmatprep.subr.bf16.mxu1 %v2193_v22  ;;  %vm231_vm1 = vcmp.eq.s32.totalorder %v2941_v10, %v2944_v23  ;;  %v217_v31 = vadd.s32 32, %v2941_v10  ;;  %v220_v15 = vadd.s32 56, %v2941_v10  ;;  %v219_v39 = vadd.s32 48, %v2941_v10 }
 0x204   :  { %vm232_vm0 = vcmp.eq.s32.totalorder %v214_v17, %v2944_v23  ;;  %vm234_vm2 = vcmp.eq.s32.totalorder %v216_v24, %v2944_v23  ;;  %vm233_vm3 = vcmp.eq.s32.totalorder %v215_v28, %v2944_v23  ;;  %v2962_v35 = vsel %vm231_vm1, 1.0, %v2761_v25 }
 0x205   :  { %v2949_v27 = vsel %vm232_vm0, 1.0, %v2761_v25  ;;  %vm236_vm4 = vcmp.eq.s32.totalorder %v218_v29, %v2944_v23  ;;  %v2966_v36 = vsel %vm234_vm2, 1.0, %v2761_v25  ;;  %vm235_vm5 = vcmp.eq.s32.totalorder %v217_v31, %v2944_v23 }
 0x206   :  { %2196 = vmatpush3.bf16.msra.mxu0 %v2193_v22  ;;  %2228 = vmatpush3.bf16.msra.mxu1 %v2193_v22  ;;  %v795_v32 = vmul.f32 0.041666668, %v2949_v27  ;;  %v2970_v37 = vsel %vm233_vm3, 1.0, %v2761_v25  ;;  %vm238_vm6 = vcmp.eq.s32.totalorder %v220_v15, %v2944_v23  ;;  %v2975_v41 = vsel %vm236_vm4, 1.0, %v2761_v25 }
 0x207   :  { %2198 = vmatprep.subr.bf16.mxu0 %v2197_v34  ;;  %2230 = vmatprep.subr.bf16.mxu1 %v2197_v34  ;;  %v222_v43 = vadd.s32 72, %v2941_v10  ;;  %v794_v44 = vmul.f32 0.041666668, %v2962_v35  ;;  %v2981_v47 = vsel %vm235_vm5, 1.0, %v2761_v25  ;;  %v221_v48 = vadd.s32 64, %v2941_v10 }
 0x208   :  { %v827_v40 = vadd.f32 %v811_v33, %v795_v32  ;;  %v797_v49 = vmul.f32 0.041666668, %v2966_v36  ;;  %v2987_v52 = vsel %vm238_vm6, 1.0, %v2761_v25  ;;  %v224_v53 = vadd.s32 88, %v2941_v10 }
 0x209   :  { %v223_v55 = vadd.s32 80, %v2941_v10  ;;  %v796_v56 = vmul.f32 0.041666668, %v2970_v37  ;;  %vm237_vm7 = vcmp.eq.s32.totalorder %v219_v39, %v2944_v23  ;;  %v226_v57 = vadd.s32 104, %v2941_v10 }
 0x20a   :  { %2200 = vmatpush3.bf16.msra.mxu0 %v2197_v34  ;;  %2232 = vmatpush3.bf16.msra.mxu1 %v2197_v34  ;;  %v799_v60 = vmul.f32 0.041666668, %v2975_v41  ;;  %vm240_vm8 = vcmp.eq.s32.totalorder %v222_v43, %v2944_v23  ;;  %v798_v63 = vmul.f32 0.041666668, %v2981_v47  ;;  %vm239_vm9 = vcmp.eq.s32.totalorder %v221_v48, %v2944_v23 }
 0x20b   :  { %2202 = vmatprep.subr.bf16.mxu0 %v2201_v42  ;;  %2234 = vmatprep.subr.bf16.mxu1 %v2201_v42  ;;  %v801_v1 = vmul.f32 0.041666668, %v2987_v52  ;;  %v715_v4 = vadd.f32 %v2949_v27, %v2865_v8  ;;  %v3006_v5 = vsel %vm237_vm7, 1.0, %v2761_v25  ;;  %vm242_vm10 = vcmp.eq.s32.totalorder %v224_v53, %v2944_v23 }
 0x20c   :  { %vm241_vm11 = vcmp.eq.s32.totalorder %v223_v55, %v2944_v23  ;;  %v826_v12 = vadd.f32 %v810_v45, %v794_v44  ;;  %v3011_v16 = vsel %vm240_vm8, 1.0, %v2761_v25  ;;  %vm244_vm12 = vcmp.eq.s32.totalorder %v226_v57, %v2944_v23 }
 0x20d   :  { %3852 = vst [vmem:[#allocation8_spill] sm:$0xff] %v3011_v16  ;;  %v225_v22 = vadd.s32 96, %v2941_v10  ;;  %v829_v34 = vadd.f32 %v813_v51, %v797_v49  ;;  %v3023_v6 = vsel %vm242_vm10, 1.0, %v2761_v25  ;;  %v3026_v17 = vsel %vm241_vm11, 1.0, %v2761_v25 }
 0x20e   :  { %2204 = vmatpush3.bf16.msra.mxu0 %v2201_v42  ;;  %2236 = vmatpush3.bf16.msra.mxu1 %v2201_v42  ;;  %v3016_v42 = vsel %vm239_vm9, 1.0, %v2761_v25  ;;  %v3028_v24 = vadd.f32 %v817_v3, %v801_v1  ;;  %v800_v28 = vmul.f32 0.041666668, %v3006_v5  ;;  %v3034_v31 = vsel %vm244_vm12, 1.0, %v2761_v25 }
 0x20f   :  { %2206 = vmatprep.subr.bf16.mxu0 %v2205_v50  ;;  %2238 = vmatprep.subr.bf16.mxu1 %v2205_v50  ;;  %v816_v15 = vmul.f32 0.008333334, %v2887_v26  ;;  %v803_v32 = vmul.f32 0.041666668, %v3011_v16  ;;  %v714_v33 = vadd.f32 %v2962_v35, %v2862_v7  ;;  %vm243_vm13 = vcmp.eq.s32.totalorder %v225_v22, %v2944_v23 }
 0x210   :  { %v228_v43 = vadd.s32 120, %v2941_v10  ;;  %v819_v51 = vmul.f32 0.008333334, %v2898_v19  ;;  %v227_v55 = vadd.s32 112, %v2941_v10  ;;  %v716_v10 = vadd.f32 %v2970_v37, %v2868_v9 }
 0x211   :  { %v832_v3 = vadd.f32 %v816_v15, %v800_v28  ;;  %v719_v15 = vadd.f32 %v2975_v41, %v2881_v18 }
 0x212   :  { %2208 = vmatpush3.bf16.msra.mxu0 %v2205_v50  ;;  %2240 = vmatpush3.bf16.msra.mxu1 %v2205_v50  ;;  %v828_v50 = vadd.f32 %v812_v59, %v796_v56  ;;  %v717_v59 = vadd.f32 %v2966_v36, %v2871_v11  ;;  %vm246_vm14 = vcmp.eq.s32.totalorder %v228_v43, %v2944_v23 }
 0x213   :  { %2210 = vmatprep.subr.bf16.mxu0 %v2209_v58  ;;  %2242 = vmatprep.subr.bf16.mxu1 %v2209_v58  ;;  %vm245_vm15 = vcmp.eq.s32.totalorder %v227_v55, %v2944_v23 }
 0x214   :  { %v3117_v43 = vsel %vm245_vm15, 1.0, %v2761_v25 }
 0x216   :  { %2212 = vmatpush3.bf16.msra.mxu0 %v2209_v58  ;;  %2244 = vmatpush3.bf16.msra.mxu1 %v2209_v58  ;;  %v3018_v58 = vadd.f32 %v815_v61, %v799_v60  ;;  %v3066_v61 = vsel %vm243_vm13, 1.0, %v2761_v25 }
 0x217   :  { %2214 = vmatprep.subr.bf16.mxu0 %v2213_v2  ;;  %2246 = vmatprep.subr.bf16.mxu1 %v2213_v2 }
 0x21a   :  { %2216 = vmatpush3.bf16.msra.mxu0 %v2213_v2  ;;  %2248 = vmatpush3.bf16.msra.mxu1 %v2213_v2  ;;  %v3020_v2 = vadd.f32 %v814_v0, %v798_v63 }
 0x21d   :  { %1882 = vmatmul.mubr.f32.vlgmr.msra.gmra.mrb[0].mxu0 %v2865_v8 }
 0x21e   :  { %1884 = vmatprep.mubr.f32.mxu0 %v2868_v9 }
 0x221   :  { %1885 = vmatmul.mubr.f32.gmra.mrb[2].mxu0 %v2871_v11 }
 0x222   :  { %1887 = vmatprep.mubr.f32.mxu0 %v2878_v13 }
 0x225   :  { %1888 = vmatmul.mubr.f32.gmra.mrb[4].mxu0 %v2881_v18 }
 0x226   :  { %1890 = vmatprep.mubr.f32.mxu0 %v2887_v26 }
 0x229   :  { %1891 = vmatmul.mubr.f32.gmra.mrb[6].mxu0 %v2890_v30 }
 0x22a   :  { %1893 = vmatprep.mubr.f32.mxu0 %v2895_v38 }
 0x22d   :  { %1894 = vmatmul.mubr.f32.gmra.mrb[8].mxu0 %v2898_v19 }
 0x22e   :  { %1896 = vmatprep.mubr.f32.mxu0 %v2903_v46 }
 0x231   :  { %1897 = vmatmul.mubr.f32.gmra.mrb[10].mxu0 %v2906_v20 }
 0x232   :  { %1899 = vmatprep.mubr.f32.mxu0 %v2911_v54 }
 0x235   :  { %1900 = vmatmul.mubr.f32.gmra.mrb[12].mxu0 %v2914_v21 }
 0x236   :  { %1902 = vmatprep.mubr.f32.mxu0 %v2919_v62 }
 0x239   :  { %1903 = vmatmul.mubr.f32.gmra.mrb[14].mxu0 %v2922_v14 }
 0x2f0   :  { %v3031_v29 = vpop.f32.mrb[0].mxu0 }
 0x2f1   :  { %v3040_v39 = vpop.f32.mrb[1].mxu0  ;;  %v843_v44 = vmul.f32 0.0013888889, %v3031_v29  ;;  %v731_v45 = vmul.f32 0.5, %v3031_v29 }
 0x2f2   :  { %3853 = vst [vmem:[#allocation9_spill] sm:$0xff] %v3040_v39  ;;  %1937 = vmatprep.mubr.f32.mxu1 %v3040_v39  ;;  %1993 = vmatprep.mubr.f32.mxu0 %v3040_v39  ;;  %v2249_v48 = vpack.c.bf16 %v3031_v29, %v3040_v39  ;;  %v842_v49 = vmul.f32 0.0013888889, %v3040_v39  ;;  %v730_v53 = vmul.f32 0.5, %v3040_v39  ;;  %v722_v39 = vadd.f32 %v3016_v42, %v2895_v38 }
 0x2f3   :  { %1938 = vmatmul.mubr.f32.vlgmr.msra.gmra.mrb[0].mxu1 %v3031_v29  ;;  %v3055_v56 = vadd.f32 %v843_v44, %v827_v40  ;;  %v3057_v57 = vadd.f32 %v731_v45, %v715_v4 }
 0x2f4   :  { %v3061_v60 = vpop.f32.mrb[2].mxu0  ;;  %2250 = vmatprep.subr.bf16.mxu0 %v2249_v48  ;;  %v3068_v63 = vadd.f32 %v842_v49, %v826_v12  ;;  %v3070_v0 = vadd.f32 %v730_v53, %v714_v33  ;;  %v802_v33 = vmul.f32 0.041666668, %v3016_v42  ;;  %v3098_v49 = vsel %vm246_vm14, 1.0, %v2761_v25 }
 0x2f5   :  { %3854 = vst [vmem:[#allocation10_spill] sm:$0xff] %v3055_v56  ;;  %3855 = vst [vmem:[#allocation11_spill] sm:$0xff] %v3057_v57  ;;  %v3074_v40 = vpop.f32.mrb[3].mxu0  ;;  %2252 = vmatpush3.bf16.msra.mxu0 %v2249_v48  ;;  %v845_v1 = vmul.f32 0.0013888889, %v3061_v60  ;;  %v733_v4 = vmul.f32 0.5, %v3061_v60 }
 0x2f6   :  { %3856 = vst [vmem:[#allocation12_spill] sm:$0xff] %v3068_v63  ;;  %3857 = vst [vmem:[#allocation13_spill] sm:$0xff] %v3070_v0  ;;  %1940 = vmatprep.mubr.f32.mxu1 %v3074_v40  ;;  %v2253_v12 = vpack.c.bf16 %v3061_v60, %v3074_v40  ;;  %v844_v22 = vmul.f32 0.0013888889, %v3074_v40  ;;  %v732_v44 = vmul.f32 0.5, %v3074_v40 }
 0x2f7   :  { %1941 = vmatmul.mubr.f32.gmra.mrb[2].mxu1 %v3061_v60  ;;  %v3087_v45 = vadd.f32 %v845_v1, %v829_v34  ;;  %v3089_v28 = vadd.f32 %v733_v4, %v717_v59  ;;  %v718_v34 = vadd.f32 %v2981_v47, %v2878_v13  ;;  %v835_v4 = vadd.f32 %v819_v51, %v803_v32 }
 0x2f8   :  { %v3093_v48 = vpop.f32.mrb[4].mxu0  ;;  %2254 = vmatprep.subr.bf16.mxu0 %v2253_v12  ;;  %v3100_v53 = vadd.f32 %v844_v22, %v828_v50  ;;  %v3102_v0 = vadd.f32 %v732_v44, %v716_v10  ;;  %v805_v51 = vmul.f32 0.041666668, %v3023_v6  ;;  %v721_v44 = vadd.f32 %v2987_v52, %v2890_v30 }
 0x2f9   :  { %3858 = vst [vmem:[#allocation14_spill] sm:$0xff] %v3087_v45  ;;  %3859 = vst [vmem:[#allocation15_spill] sm:$0xff] %v3089_v28  ;;  %v3106_v59 = vpop.f32.mrb[5].mxu0  ;;  %2256 = vmatpush3.bf16.msra.mxu0 %v2253_v12  ;;  %v847_v1 = vmul.f32 0.0013888889, %v3093_v48  ;;  %v735_v45 = vmul.f32 0.5, %v3093_v48 }
 0x2fa   :  { %3860 = vst [vmem:[#allocation16_spill] sm:$0xff] %v3100_v53  ;;  %3861 = vst [vmem:[#allocation17_spill] sm:$0xff] %v3102_v0  ;;  %v818_v28 = vmul.f32 0.008333334, %v2895_v38  ;;  %1943 = vmatprep.mubr.f32.mxu1 %v3106_v59  ;;  %v2257_v50 = vpack.c.bf16 %v3093_v48, %v3106_v59  ;;  %v846_v10 = vmul.f32 0.0013888889, %v3106_v59 }
 0x2fb   :  { %v734_v12 = vmul.f32 0.5, %v3106_v59  ;;  %1944 = vmatmul.mubr.f32.gmra.mrb[4].mxu1 %v3093_v48  ;;  %v3123_v32 = vadd.f32 %v847_v1, %v3018_v58  ;;  %v3126_v22 = vadd.f32 %v735_v45, %v719_v15  ;;  %v821_v25 = vmul.f32 0.008333334, %v2906_v20 }
 0x2fc   :  { %v3130_v0 = vpop.f32.mrb[6].mxu0  ;;  %2258 = vmatprep.subr.bf16.mxu0 %v2257_v50  ;;  %v3133_v23 = vadd.f32 %v846_v10, %v3020_v2  ;;  %v720_v58 = vadd.f32 %v3006_v5, %v2887_v26  ;;  %v804_v15 = vmul.f32 0.041666668, %v3026_v17  ;;  %v823_v56 = vmul.f32 0.008333334, %v2914_v21 }
 0x2fd   :  { %3862 = vst [vmem:[#allocation18_spill] sm:$0xff] %v3123_v32  ;;  %3863 = vst [vmem:[#allocation19_spill] sm:$0xff] %v3126_v22  ;;  %v3136_v55 = vadd.f32 %v734_v12, %v718_v34  ;;  %v3140_v1 = vpop.f32.mrb[7].mxu0  ;;  %2260 = vmatpush3.bf16.msra.mxu0 %v2257_v50  ;;  %v849_v45 = vmul.f32 0.0013888889, %v3130_v0  ;;  %v723_v22 = vadd.f32 %v3011_v16, %v2898_v19  ;;  %v737_v2 = vmul.f32 0.5, %v3130_v0 }
 0x2fe   :  { %3864 = vst [vmem:[#allocation20_spill] sm:$0xff] %v3133_v23  ;;  %1946 = vmatprep.mubr.f32.mxu1 %v3140_v1  ;;  %v2261_v34 = vpack.c.bf16 %v3130_v0, %v3140_v1  ;;  %v848_v10 = vmul.f32 0.0013888889, %v3140_v1  ;;  %v820_v12 = vmul.f32 0.008333334, %v2903_v46  ;;  %v736_v50 = vmul.f32 0.5, %v3140_v1 }
 0x2ff   :  { %3865 = vst [vmem:[#allocation21_spill] sm:$0xff] %v3136_v55  ;;  %1947 = vmatmul.mubr.f32.gmra.mrb[6].mxu1 %v3130_v0  ;;  %v3155_v55 = vadd.f32 %v849_v45, %v3028_v24  ;;  %v834_v23 = vadd.f32 %v818_v28, %v802_v33  ;;  %v807_v32 = vmul.f32 0.041666668, %v3034_v31  ;;  %v3158_v53 = vadd.f32 %v737_v2, %v721_v44 }
 0x300   :  { %v3160_v63 = vpop.f32.mrb[8].mxu0  ;;  %2262 = vmatprep.subr.bf16.mxu0 %v2261_v34  ;;  %v3162_v57 = vadd.f32 %v848_v10, %v832_v3  ;;  %v3167_v19 = vadd.f32 %v736_v50, %v720_v58  ;;  %v837_v33 = vadd.f32 %v821_v25, %v805_v51  ;;  %v806_v28 = vmul.f32 0.041666668, %v3066_v61 }
 0x301   :  { %3866 = vst [vmem:[#allocation22_spill] sm:$0xff] %v3155_v55  ;;  %3867 = vst [vmem:[#allocation23_spill] sm:$0xff] %v3158_v53  ;;  %v3169_v16 = vpop.f32.mrb[9].mxu0  ;;  %2264 = vmatpush3.bf16.msra.mxu0 %v2261_v34  ;;  %v851_v24 = vmul.f32 0.0013888889, %v3160_v63  ;;  %v739_v44 = vmul.f32 0.5, %v3160_v63  ;;  %v836_v2 = vadd.f32 %v820_v12, %v804_v15  ;;  %v725_v10 = vadd.f32 %v3023_v6, %v2906_v20 }
 0x302   :  { %3868 = vst [vmem:[#allocation24_spill] sm:$0xff] %v3162_v57  ;;  %3869 = vst [vmem:[#allocation25_spill] sm:$0xff] %v3167_v19  ;;  %1949 = vmatprep.mubr.f32.mxu1 %v3169_v16  ;;  %v2265_v3 = vpack.c.bf16 %v3160_v63, %v3169_v16  ;;  %v850_v45 = vmul.f32 0.0013888889, %v3169_v16  ;;  %v738_v58 = vmul.f32 0.5, %v3169_v16 }
 0x303   :  { %1950 = vmatmul.mubr.f32.gmra.mrb[8].mxu1 %v3160_v63  ;;  %v3180_v34 = vadd.f32 %v851_v24, %v835_v4  ;;  %v822_v51 = vmul.f32 0.008333334, %v2911_v54  ;;  %v3183_v25 = vadd.f32 %v739_v44, %v723_v22  ;;  %v809_v15 = vmul.f32 0.041666668, %v3098_v49 }
 0x304   :  { %v3187_v50 = vpop.f32.mrb[10].mxu0  ;;  %2266 = vmatprep.subr.bf16.mxu0 %v2265_v3  ;;  %v3189_v19 = vadd.f32 %v850_v45, %v834_v23  ;;  %v3192_v12 = vadd.f32 %v738_v58, %v722_v39  ;;  %v724_v4 = vadd.f32 %v3026_v17, %v2903_v46  ;;  %v839_v44 = vadd.f32 %v823_v56, %v807_v32 }
 0x305   :  { %3870 = vst [vmem:[#allocation26_spill] sm:$0xff] %v3180_v34  ;;  %3871 = vst [vmem:[#allocation27_spill] sm:$0xff] %v3183_v25  ;;  %v3196_v24 = vpop.f32.mrb[11].mxu0  ;;  %2268 = vmatpush3.bf16.msra.mxu0 %v2265_v3  ;;  %v853_v22 = vmul.f32 0.0013888889, %v3187_v50  ;;  %v741_v34 = vmul.f32 0.5, %v3187_v50  ;;  %v838_v53 = vadd.f32 %v822_v51, %v806_v28  ;;  %v726_v46 = vadd.f32 %v3066_v61, %v2911_v54 }
 0x306   :  { %3872 = vst [vmem:[#allocation28_spill] sm:$0xff] %v3189_v19  ;;  %3873 = vst [vmem:[#allocation29_spill] sm:$0xff] %v3192_v12  ;;  %v825_v25 = vmul.f32 0.008333334, %v2922_v14  ;;  %1952 = vmatprep.mubr.f32.mxu1 %v3196_v24  ;;  %v2269_v23 = vpack.c.bf16 %v3187_v50, %v3196_v24  ;;  %v852_v39 = vmul.f32 0.0013888889, %v3196_v24  ;;  %v727_v12 = vadd.f32 %v3034_v31, %v2914_v21 }
 0x307   :  { %v808_v45 = vmul.f32 0.041666668, %v3117_v43  ;;  %v740_v58 = vmul.f32 0.5, %v3196_v24  ;;  %1953 = vmatmul.mubr.f32.gmra.mrb[10].mxu1 %v3187_v50  ;;  %v3208_v3 = vadd.f32 %v853_v22, %v837_v33  ;;  %v824_v56 = vmul.f32 0.008333334, %v2919_v62 }
 0x308   :  { %v3211_v32 = vadd.f32 %v741_v34, %v725_v10  ;;  %v3215_v19 = vpop.f32.mrb[12].mxu0  ;;  %2270 = vmatprep.subr.bf16.mxu0 %v2269_v23  ;;  %v3217_v57 = vadd.f32 %v852_v39, %v836_v2 }
 0x309   :  { %3874 = vst [vmem:[#allocation30_spill] sm:$0xff] %v3208_v3  ;;  %v3219_v55 = vadd.f32 %v740_v58, %v724_v4  ;;  %v3223_v33 = vpop.f32.mrb[13].mxu0  ;;  %2272 = vmatpush3.bf16.msra.mxu0 %v2269_v23  ;;  %v855_v34 = vmul.f32 0.0013888889, %v3215_v19  ;;  %v743_v10 = vmul.f32 0.5, %v3215_v19  ;;  %v841_v4 = vadd.f32 %v825_v25, %v809_v15 }
 0x30a   :  { %3875 = vst [vmem:[#allocation31_spill] sm:$0xff] %v3211_v32  ;;  %3876 = vst [vmem:[#allocation32_spill] sm:$0xff] %v3217_v57  ;;  %1955 = vmatprep.mubr.f32.mxu1 %v3223_v33  ;;  %v2273_v22 = vpack.c.bf16 %v3215_v19, %v3223_v33  ;;  %v854_v2 = vmul.f32 0.0013888889, %v3223_v33  ;;  %v742_v28 = vmul.f32 0.5, %v3223_v33  ;;  %v729_v23 = vadd.f32 %v3098_v49, %v2922_v14 }
 0x30b   :  { %3877 = vst [vmem:[#allocation33_spill] sm:$0xff] %v3219_v55  ;;  %1956 = vmatmul.mubr.f32.gmra.mrb[12].mxu1 %v3215_v19  ;;  %v3233_v51 = vadd.f32 %v855_v34, %v839_v44  ;;  %v3235_v39 = vadd.f32 %v743_v10, %v727_v12  ;;  %v840_v57 = vadd.f32 %v824_v56, %v808_v45  ;;  %v906_v10 = vmul.f32 2.4801588e-05, %v2962_v35 }
 0x30c   :  { %v3239_v58 = vpop.f32.mrb[14].mxu0  ;;  %2274 = vmatprep.subr.bf16.mxu0 %v2273_v22  ;;  %v3241_v55 = vadd.f32 %v854_v2, %v838_v53  ;;  %v3243_v32 = vadd.f32 %v742_v28, %v726_v46  ;;  %v728_v3 = vadd.f32 %v3117_v43, %v2919_v62  ;;  %v909_v2 = vmul.f32 2.4801588e-05, %v2966_v36 }
 0x30d   :  { %v3247_v54 = vpop.f32.mrb[15].mxu0  ;;  %2276 = vmatpush3.bf16.msra.mxu0 %v2273_v22  ;;  %v857_v25 = vmul.f32 0.0013888889, %v3239_v58  ;;  %v745_v15 = vmul.f32 0.5, %v3239_v58  ;;  %v922_v22 = vmul.f32 2.7557319e-06, %v2862_v7 }
 0x30e   :  { %1958 = vmatprep.mubr.f32.mxu1 %v3247_v54  ;;  %v2277_v12 = vpack.c.bf16 %v3239_v58, %v3247_v54  ;;  %v856_v53 = vmul.f32 0.0013888889, %v3247_v54  ;;  %v744_v46 = vmul.f32 0.5, %v3247_v54  ;;  %v925_v28 = vmul.f32 2.7557319e-06, %v2871_v11 }
 0x30f   :  { %1959 = vmatmul.mubr.f32.gmra.mrb[14].mxu1 %v3239_v58  ;;  %v3257_v44 = vadd.f32 %v857_v25, %v841_v4  ;;  %v3259_v45 = vadd.f32 %v745_v15, %v729_v23  ;;  %v908_v4 = vmul.f32 2.4801588e-05, %v2970_v37  ;;  %v924_v23 = vmul.f32 2.7557319e-06, %v2868_v9 }
 0x310   :  { %2278 = vmatprep.subr.bf16.mxu0 %v2277_v12  ;;  %v3261_v56 = vadd.f32 %v856_v53, %v840_v57  ;;  %v3263_v34 = vadd.f32 %v744_v46, %v728_v3  ;;  %v907_v57 = vmul.f32 2.4801588e-05, %v2949_v27  ;;  %v923_v3 = vmul.f32 2.7557319e-06, %v2865_v8  ;;  %v3879_v53 = vld [vmem:[#allocation8_spill] sm:$0xff]  ;;  %v3880_v46 = vld [vmem:[#allocation5_spill] sm:$0xff] }
 0x311   :  { %2280 = vmatpush3.bf16.msra.mxu0 %v2277_v12  ;;  %v911_v25 = vmul.f32 2.4801588e-05, %v2975_v41  ;;  %v927_v15 = vmul.f32 2.7557319e-06, %v2881_v18  ;;  %v910_v27 = vmul.f32 2.4801588e-05, %v2981_v47  ;;  %v938_v37 = vadd.f32 %v922_v22, %v906_v10 }
 0x312   :  { %3878 = vst [vmem:[#allocation34_spill] sm:$0xff] %v3263_v34  ;;  %v926_v8 = vmul.f32 2.7557319e-06, %v2878_v13  ;;  %v913_v35 = vmul.f32 2.4801588e-05, %v2987_v52  ;;  %v939_v12 = vadd.f32 %v923_v3, %v907_v57  ;;  %v941_v34 = vadd.f32 %v925_v28, %v909_v2 }
 0x313   :  { %v929_v7 = vmul.f32 2.7557319e-06, %v2890_v30  ;;  %v912_v36 = vmul.f32 2.4801588e-05, %v3006_v5  ;;  %v928_v11 = vmul.f32 2.7557319e-06, %v2887_v26  ;;  %v940_v57 = vadd.f32 %v924_v23, %v908_v4 }
 0x314   :  { %1994 = vmatmul.mubr.f32.vlgmr.msra.gmra.mrb[16].mxu0 %v3031_v29  ;;  %v915_v9 = vmul.f32 2.4801588e-05, %v3879_v53  ;;  %v931_v41 = vmul.f32 2.7557319e-06, %v3880_v46  ;;  %v914_v18 = vmul.f32 2.4801588e-05, %v3016_v42  ;;  %v943_v10 = vadd.f32 %v927_v15, %v911_v25 }
 0x315   :  { %1996 = vmatprep.mubr.f32.mxu0 %v3074_v40  ;;  %v930_v47 = vmul.f32 2.7557319e-06, %v2895_v38  ;;  %v917_v13 = vmul.f32 2.4801588e-05, %v3023_v6  ;;  %v933_v52 = vmul.f32 2.7557319e-06, %v2906_v20  ;;  %v942_v28 = vadd.f32 %v926_v8, %v910_v27 }
 0x316   :  { %v916_v30 = vmul.f32 2.4801588e-05, %v3026_v17  ;;  %v3881_v5 = vld [vmem:[#allocation6_spill] sm:$0xff]  ;;  %v919_v26 = vmul.f32 2.4801588e-05, %v3034_v31  ;;  %v3882_v42 = vld [vmem:[#allocation7_spill] sm:$0xff]  ;;  %v945_v23 = vadd.f32 %v929_v7, %v913_v35  ;;  %v3314_v25 = vadd.f32 %v928_v11, %v912_v36 }
 0x317   :  { %v932_v3 = vmul.f32 2.7557319e-06, %v3881_v5  ;;  %v935_v22 = vmul.f32 2.7557319e-06, %v2914_v21  ;;  %v918_v53 = vmul.f32 2.4801588e-05, %v3066_v61  ;;  %v3316_v21 = vadd.f32 %v931_v41, %v915_v9 }
 0x318   :  { %1997 = vmatmul.mubr.f32.gmra.mrb[18].mxu0 %v3061_v60  ;;  %v934_v2 = vmul.f32 2.7557319e-06, %v3882_v42  ;;  %v955_v38 = vmul.f32 2.755732e-07, %v3031_v29  ;;  %v921_v6 = vmul.f32 2.4801588e-05, %v3098_v49  ;;  %v3318_v61 = vadd.f32 %v930_v47, %v914_v18 }
 0x319   :  { %1999 = vmatprep.mubr.f32.mxu0 %v3106_v59  ;;  %v937_v20 = vmul.f32 2.7557319e-06, %v2922_v14  ;;  %v3883_v4 = vld [vmem:[#allocation9_spill] sm:$0xff]  ;;  %v920_v46 = vmul.f32 2.4801588e-05, %v3117_v43  ;;  %v3320_v15 = vadd.f32 %v933_v52, %v917_v13  ;;  %v3323_v27 = vadd.f32 %v932_v3, %v916_v30 }
 0x31a   :  { %v954_v17 = vmul.f32 2.755732e-07, %v3883_v4  ;;  %v936_v31 = vmul.f32 2.7557319e-06, %v2919_v62  ;;  %v957_v49 = vmul.f32 2.755732e-07, %v3061_v60  ;;  %v3325_v14 = vadd.f32 %v935_v22, %v919_v26 }
 0x31b   :  { %v3327_v8 = vadd.f32 %v934_v2, %v918_v53  ;;  %v971_v62 = vadd.f32 %v955_v38, %v939_v12  ;;  %v956_v9 = vmul.f32 2.755732e-07, %v3074_v40  ;;  %v3330_v41 = vadd.f32 %v937_v20, %v921_v6  ;;  %v3884_v26 = vld [vmem:[#allocation10_spill] sm:$0xff]  ;;  %v3885_v22 = vld [vmem:[#allocation11_spill] sm:$0xff]  ;;  %v3886_v4 = vld [vmem:[#allocation12_spill] sm:$0xff] }
 0x31c   :  { %2000 = vmatmul.mubr.f32.gmra.mrb[20].mxu0 %v3093_v48  ;;  %v970_v11 = vadd.f32 %v954_v17, %v938_v37  ;;  %v3332_v18 = vadd.f32 %v936_v31, %v920_v46  ;;  %v973_v5 = vadd.f32 %v957_v49, %v941_v34  ;;  %v959_v3 = vmul.f32 2.755732e-07, %v3093_v48  ;;  %v3887_v34 = vld [vmem:[#allocation13_spill] sm:$0xff] }
 0x31d   :  { %2002 = vmatprep.mubr.f32.mxu0 %v3140_v1  ;;  %v972_v6 = vadd.f32 %v956_v9, %v940_v57  ;;  %v958_v20 = vmul.f32 2.755732e-07, %v3106_v59  ;;  %v3889_v57 = vld [vmem:[#allocation15_spill] sm:$0xff] }
 0x320   :  { %2003 = vmatmul.mubr.f32.gmra.mrb[22].mxu0 %v3130_v0 }
 0x321   :  { %2005 = vmatprep.mubr.f32.mxu0 %v3169_v16 }
 0x324   :  { %2006 = vmatmul.mubr.f32.gmra.mrb[24].mxu0 %v3160_v63 }
 0x325   :  { %2008 = vmatprep.mubr.f32.mxu0 %v3196_v24 }
 0x328   :  { %2009 = vmatmul.mubr.f32.gmra.mrb[26].mxu0 %v3187_v50 }
 0x329   :  { %2011 = vmatprep.mubr.f32.mxu0 %v3223_v33 }
 0x32c   :  { %2012 = vmatmul.mubr.f32.gmra.mrb[28].mxu0 %v3215_v19 }
 0x32d   :  { %2014 = vmatprep.mubr.f32.mxu0 %v3247_v54 }
 0x330   :  { %2015 = vmatmul.mubr.f32.gmra.mrb[30].mxu0 %v3239_v58 }
 0x3c6   :  { %v1939_v29 = vpop.f32.mrb[0].mxu1 }
 0x3c7   :  { %v763_v43 = vmul.f32 0.16666667, %v1939_v29  ;;  %v875_v35 = vmul.f32 0.0001984127, %v1939_v29  ;;  %v987_v7 = vmul.f32 2.5052108e-08, %v1939_v29 }
 0x3c8   :  { %v490_v36 = vpop.f32.mrb[1].mxu1 }
 0x3c9   :  { %v3334_v47 = vadd.f32 %v987_v7, %v971_v62  ;;  %v762_v60 = vmul.f32 0.16666667, %v490_v36  ;;  %v874_v13 = vmul.f32 0.0001984127, %v490_v36  ;;  %v986_v52 = vmul.f32 2.5052108e-08, %v490_v36 }
 0x3ca   :  { %v1942_v30 = vpop.f32.mrb[2].mxu1  ;;  %v3338_v12 = vadd.f32 %v875_v35, %v3884_v26  ;;  %v3341_v37 = vadd.f32 %v763_v43, %v3885_v22  ;;  %v975_v35 = vadd.f32 %v959_v3, %v943_v10  ;;  %v961_v62 = vmul.f32 2.755732e-07, %v3130_v0  ;;  %v3888_v7 = vld [vmem:[#allocation14_spill] sm:$0xff]  ;;  %v3890_v26 = vld [vmem:[#allocation16_spill] sm:$0xff]  ;;  %v3891_v10 = vld [vmem:[#allocation17_spill] sm:$0xff] }
 0x3cb   :  { %v3343_v40 = vadd.f32 %v986_v52, %v970_v11  ;;  %v765_v53 = vmul.f32 0.16666667, %v1942_v30  ;;  %v877_v42 = vmul.f32 0.0001984127, %v1942_v30  ;;  %v989_v2 = vmul.f32 2.5052108e-08, %v1942_v30 }
 0x3cc   :  { %v500_v38 = vpop.f32.mrb[3].mxu1  ;;  %v3347_v17 = vadd.f32 %v874_v13, %v3886_v4  ;;  %v3350_v48 = vadd.f32 %v762_v60, %v3887_v34  ;;  %v974_v30 = vadd.f32 %v958_v20, %v942_v28  ;;  %v963_v4 = vmul.f32 2.755732e-07, %v3160_v63  ;;  %v3892_v34 = vld [vmem:[#allocation18_spill] sm:$0xff]  ;;  %v3893_v28 = vld [vmem:[#allocation19_spill] sm:$0xff]  ;;  %v3895_v63 = vld [vmem:[#allocation21_spill] sm:$0xff] }
 0x3cd   :  { %v3352_v46 = vadd.f32 %v989_v2, %v973_v5  ;;  %v764_v31 = vmul.f32 0.16666667, %v500_v38  ;;  %v876_v29 = vmul.f32 0.0001984127, %v500_v38  ;;  %v988_v49 = vmul.f32 2.5052108e-08, %v500_v38 }
 0x3ce   :  { %v1945_v43 = vpop.f32.mrb[4].mxu1  ;;  %v3356_v36 = vadd.f32 %v877_v42, %v3888_v7  ;;  %v3359_v59 = vadd.f32 %v765_v53, %v3889_v57  ;;  %v960_v5 = vmul.f32 2.755732e-07, %v3140_v1  ;;  %v962_v57 = vmul.f32 2.755732e-07, %v3169_v16  ;;  %v3898_v16 = vld [vmem:[#allocation23_spill] sm:$0xff] }
 0x3cf   :  { %v3361_v11 = vadd.f32 %v988_v49, %v972_v6  ;;  %v767_v9 = vmul.f32 0.16666667, %v1945_v43  ;;  %v879_v60 = vmul.f32 0.0001984127, %v1945_v43  ;;  %v991_v13 = vmul.f32 2.5052108e-08, %v1945_v43 }
 0x3d0   :  { %v510_v52 = vpop.f32.mrb[5].mxu1  ;;  %v3365_v22 = vadd.f32 %v876_v29, %v3890_v26  ;;  %v3368_v0 = vadd.f32 %v764_v31, %v3891_v10  ;;  %v977_v6 = vadd.f32 %v961_v62, %v945_v23  ;;  %v976_v7 = vadd.f32 %v960_v5, %v3314_v25 }
 0x3d1   :  { %v3370_v3 = vadd.f32 %v991_v13, %v975_v35  ;;  %v766_v42 = vmul.f32 0.16666667, %v510_v52  ;;  %v878_v53 = vmul.f32 0.0001984127, %v510_v52  ;;  %v990_v2 = vmul.f32 2.5052108e-08, %v510_v52 }
 0x3d2   :  { %v1948_v38 = vpop.f32.mrb[6].mxu1  ;;  %v3374_v49 = vadd.f32 %v879_v60, %v3892_v34  ;;  %v3377_v1 = vadd.f32 %v767_v9, %v3893_v28  ;;  %v3894_v13 = vld [vmem:[#allocation20_spill] sm:$0xff]  ;;  %v979_v10 = vadd.f32 %v963_v4, %v3316_v21 }
 0x3d3   :  { %v3379_v20 = vadd.f32 %v990_v2, %v974_v30  ;;  %v769_v29 = vmul.f32 0.16666667, %v1948_v38  ;;  %v881_v31 = vmul.f32 0.0001984127, %v1948_v38  ;;  %v993_v43 = vmul.f32 2.5052108e-08, %v1948_v38 }
 0x3d4   :  { %v520_v35 = vpop.f32.mrb[7].mxu1  ;;  %v3384_v23 = vadd.f32 %v878_v53, %v3894_v13  ;;  %v3387_v62 = vadd.f32 %v766_v42, %v3895_v63  ;;  %v965_v2 = vmul.f32 2.755732e-07, %v3187_v50  ;;  %v3897_v38 = vld [vmem:[#allocation22_spill] sm:$0xff]  ;;  %v3900_v13 = vld [vmem:[#allocation24_spill] sm:$0xff]  ;;  %v3901_v50 = vld [vmem:[#allocation25_spill] sm:$0xff] }
 0x3d5   :  { %v3389_v60 = vadd.f32 %v993_v43, %v977_v6  ;;  %v768_v9 = vmul.f32 0.16666667, %v520_v35  ;;  %v880_v52 = vmul.f32 0.0001984127, %v520_v35  ;;  %v992_v30 = vmul.f32 2.5052108e-08, %v520_v35 }
 0x3d6   :  { %3896 = vst [vmem:[#allocation8_spill] sm:$0xff] %v3387_v62  ;;  %v1951_v26 = vpop.f32.mrb[8].mxu1  ;;  %v3394_v25 = vadd.f32 %v881_v31, %v3897_v38  ;;  %v3397_v5 = vadd.f32 %v769_v29, %v3898_v16  ;;  %v978_v43 = vadd.f32 %v962_v57, %v3318_v61  ;;  %v964_v35 = vmul.f32 2.755732e-07, %v3196_v24  ;;  %v3903_v16 = vld [vmem:[#allocation26_spill] sm:$0xff]  ;;  %v3904_v24 = vld [vmem:[#allocation27_spill] sm:$0xff] }
 0x3d7   :  { %v3399_v53 = vadd.f32 %v992_v30, %v976_v7  ;;  %v771_v42 = vmul.f32 0.16666667, %v1951_v26  ;;  %v883_v34 = vmul.f32 0.0001984127, %v1951_v26  ;;  %v995_v6 = vmul.f32 2.5052108e-08, %v1951_v26 }
 0x3d8   :  { %3899 = vst [vmem:[#allocation5_spill] sm:$0xff] %v3397_v5  ;;  %v530_v28 = vpop.f32.mrb[9].mxu1  ;;  %v3404_v21 = vadd.f32 %v880_v52, %v3900_v13  ;;  %v3407_v4 = vadd.f32 %v768_v9, %v3901_v50  ;;  %v981_v38 = vadd.f32 %v965_v2, %v3320_v15  ;;  %v967_v26 = vmul.f32 2.755732e-07, %v3215_v19  ;;  %v3906_v19 = vld [vmem:[#allocation29_spill] sm:$0xff]  ;;  %v3907_v5 = vld [vmem:[#allocation30_spill] sm:$0xff] }
 0x3d9   :  { %v3409_v31 = vadd.f32 %v995_v6, %v979_v10  ;;  %v770_v29 = vmul.f32 0.16666667, %v530_v28  ;;  %v882_v63 = vmul.f32 0.0001984127, %v530_v28  ;;  %v994_v7 = vmul.f32 2.5052108e-08, %v530_v28 }
 0x3da   :  { %3902 = vst [vmem:[#allocation6_spill] sm:$0xff] %v3407_v4  ;;  %v1954_v30 = vpop.f32.mrb[10].mxu1  ;;  %v3414_v61 = vadd.f32 %v883_v34, %v3903_v16  ;;  %v3417_v57 = vadd.f32 %v771_v42, %v3904_v24  ;;  %v980_v50 = vadd.f32 %v964_v35, %v3323_v27  ;;  %v966_v28 = vmul.f32 2.755732e-07, %v3223_v33  ;;  %v3905_v4 = vld [vmem:[#allocation28_spill] sm:$0xff]  ;;  %v3908_v33 = vld [vmem:[#allocation31_spill] sm:$0xff] }
 0x3db   :  { %v3419_v52 = vadd.f32 %v994_v7, %v978_v43  ;;  %v773_v9 = vmul.f32 0.16666667, %v1954_v30  ;;  %v885_v13 = vmul.f32 0.0001984127, %v1954_v30  ;;  %v997_v10 = vmul.f32 2.5052108e-08, %v1954_v30 }
 0x3dc   :  { %v540_v6 = vpop.f32.mrb[11].mxu1  ;;  %v3424_v15 = vadd.f32 %v882_v63, %v3905_v4  ;;  %v3427_v2 = vadd.f32 %v770_v29, %v3906_v19  ;;  %v983_v24 = vadd.f32 %v967_v26, %v3325_v14  ;;  %v969_v30 = vmul.f32 2.755732e-07, %v3239_v58  ;;  %v3909_v62 = vld [vmem:[#allocation32_spill] sm:$0xff]  ;;  %v3910_v58 = vld [vmem:[#allocation33_spill] sm:$0xff] }
 0x3dd   :  { %v3429_v34 = vadd.f32 %v997_v10, %v981_v38  ;;  %v772_v42 = vmul.f32 0.16666667, %v540_v6  ;;  %v884_v16 = vmul.f32 0.0001984127, %v540_v6  ;;  %v996_v43 = vmul.f32 2.5052108e-08, %v540_v6 }
 0x3de   :  { %v1957_v7 = vpop.f32.mrb[12].mxu1  ;;  %v3434_v27 = vadd.f32 %v885_v13, %v3907_v5  ;;  %v3437_v35 = vadd.f32 %v773_v9, %v3908_v33  ;;  %v982_v19 = vadd.f32 %v966_v28, %v3327_v8  ;;  %v968_v6 = vmul.f32 2.755732e-07, %v3247_v54 }
 0x3df   :  { %v3439_v4 = vadd.f32 %v996_v43, %v980_v50  ;;  %v775_v29 = vmul.f32 0.16666667, %v1957_v7  ;;  %v887_v63 = vmul.f32 0.0001984127, %v1957_v7  ;;  %v999_v38 = vmul.f32 2.5052108e-08, %v1957_v7 }
 0x3e0   :  { %v550_v10 = vpop.f32.mrb[13].mxu1  ;;  %v3444_v14 = vadd.f32 %v884_v16, %v3909_v62  ;;  %v3447_v26 = vadd.f32 %v772_v42, %v3910_v58  ;;  %v985_v33 = vadd.f32 %v969_v30, %v3330_v41 }
 0x3e1   :  { %v3449_v5 = vadd.f32 %v999_v38, %v983_v24  ;;  %v774_v9 = vmul.f32 0.16666667, %v550_v10  ;;  %v886_v13 = vmul.f32 0.0001984127, %v550_v10  ;;  %v998_v50 = vmul.f32 2.5052108e-08, %v550_v10 }
 0x3e2   :  { %v1960_v43 = vpop.f32.mrb[14].mxu1  ;;  %v3453_v7 = vadd.f32 %v887_v63, %v3233_v51  ;;  %v3456_v8 = vadd.f32 %v775_v29, %v3235_v39  ;;  %v984_v24 = vadd.f32 %v968_v6, %v3332_v18 }
 0x3e3   :  { %v3458_v54 = vadd.f32 %v998_v50, %v982_v19  ;;  %v777_v62 = vmul.f32 0.16666667, %v1960_v43  ;;  %v889_v28 = vmul.f32 0.0001984127, %v1960_v43  ;;  %v1001_v42 = vmul.f32 2.5052108e-08, %v1960_v43 }
 0x3e4   :  { %v560_v16 = vpop.f32.mrb[15].mxu1  ;;  %v3462_v38 = vadd.f32 %v886_v13, %v3241_v55  ;;  %v3465_v10 = vadd.f32 %v774_v9, %v3243_v32  ;;  %v3911_v32 = vld [vmem:[#allocation34_spill] sm:$0xff] }
 0x3e5   :  { %v3467_v41 = vadd.f32 %v1001_v42, %v985_v33  ;;  %v776_v51 = vmul.f32 0.16666667, %v560_v16  ;;  %v888_v30 = vmul.f32 0.0001984127, %v560_v16  ;;  %v1000_v39 = vmul.f32 2.5052108e-08, %v560_v16 }
 0x3e6   :  { %v3470_v29 = vadd.f32 %v889_v28, %v3257_v44  ;;  %v3473_v63 = vadd.f32 %v777_v62, %v3259_v45 }
 0x3e7   :  { %v3475_v19 = vadd.f32 %v1000_v39, %v984_v24  ;;  %v3477_v18 = vpop.f32.mrb[16].mxu0  ;;  %v3480_v55 = vadd.f32 %v888_v30, %v3261_v56  ;;  %v3483_v6 = vadd.f32 %v776_v51, %v3911_v32 }
 0x3e8   :  { %v1019_v58 = vmul.f32 2.0876756e-09, %v3477_v18  ;;  %v635_v9 = vpop.f32.mrb[17].mxu0 }
 0x3e9   :  { %v1018_v13 = vmul.f32 2.0876756e-09, %v635_v9  ;;  %2049 = vmatprep.mubr.f32.mxu1 %v635_v9  ;;  %2105 = vmatprep.mubr.f32.mxu0 %v635_v9 }
 0x3ea   :  { %v1035_v44 = vadd.f32 %v1019_v58, %v3334_v47 }
 0x3eb   :  { %v1034_v45 = vadd.f32 %v1018_v13, %v3343_v40  ;;  %v3488_v50 = vpop.f32.mrb[18].mxu0 }
 0x3ec   :  { %v1021_v43 = vmul.f32 2.0876756e-09, %v3488_v50  ;;  %v3491_v33 = vpop.f32.mrb[19].mxu0 }
 0x3ed   :  { %v1020_v56 = vmul.f32 2.0876756e-09, %v3491_v33  ;;  %v2281_v62 = vpack.c.bf16 %v1035_v44, %v1034_v45 }
 0x3ee   :  { %v1037_v28 = vadd.f32 %v1021_v43, %v3352_v46 }
 0x3ef   :  { %v1036_v42 = vadd.f32 %v1020_v56, %v3361_v11  ;;  %v3496_v16 = vpop.f32.mrb[20].mxu0  ;;  %2282 = vmatprep.subr.bf16.mxu1 %v2281_v62 }
 0x3f0   :  { %v1023_v47 = vmul.f32 2.0876756e-09, %v3496_v16  ;;  %v3499_v24 = vpop.f32.mrb[21].mxu0  ;;  %2284 = vmatpush3.bf16.msra.mxu1 %v2281_v62 }
 0x3f1   :  { %v1022_v40 = vmul.f32 2.0876756e-09, %v3499_v24  ;;  %v2285_v51 = vpack.c.bf16 %v1037_v28, %v1036_v42 }
 0x3f2   :  { %v1039_v30 = vadd.f32 %v1023_v47, %v3370_v3 }
 0x3f3   :  { %v1038_v39 = vadd.f32 %v1022_v40, %v3379_v20  ;;  %v3504_v32 = vpop.f32.mrb[22].mxu0  ;;  %2286 = vmatprep.subr.bf16.mxu1 %v2285_v51 }
 0x3f4   :  { %v1025_v46 = vmul.f32 2.0876756e-09, %v3504_v32  ;;  %v3507_v11 = vpop.f32.mrb[23].mxu0  ;;  %2288 = vmatpush3.bf16.msra.mxu1 %v2285_v51 }
 0x3f5   :  { %v1024_v58 = vmul.f32 2.0876756e-09, %v3507_v11  ;;  %v2289_v9 = vpack.c.bf16 %v1039_v30, %v1038_v39 }
 0x3f6   :  { %v1041_v13 = vadd.f32 %v1025_v46, %v3389_v60 }
 0x3f7   :  { %v1040_v44 = vadd.f32 %v1024_v58, %v3399_v53  ;;  %v3512_v45 = vpop.f32.mrb[24].mxu0  ;;  %2290 = vmatprep.subr.bf16.mxu1 %v2289_v9 }
 0x3f8   :  { %v1027_v3 = vmul.f32 2.0876756e-09, %v3512_v45  ;;  %v675_v20 = vpop.f32.mrb[25].mxu0  ;;  %2292 = vmatpush3.bf16.msra.mxu1 %v2289_v9 }
 0x3f9   :  { %v1026_v43 = vmul.f32 2.0876756e-09, %v675_v20  ;;  %v2293_v56 = vpack.c.bf16 %v1041_v13, %v1040_v44 }
 0x3fa   :  { %v1043_v62 = vadd.f32 %v1027_v3, %v3409_v31 }
 0x3fb   :  { %v1042_v28 = vadd.f32 %v1026_v43, %v3419_v52  ;;  %v3517_v42 = vpop.f32.mrb[26].mxu0  ;;  %2294 = vmatprep.subr.bf16.mxu1 %v2293_v56 }
 0x3fc   :  { %v1029_v60 = vmul.f32 2.0876756e-09, %v3517_v42  ;;  %v3520_v47 = vpop.f32.mrb[27].mxu0  ;;  %2296 = vmatpush3.bf16.msra.mxu1 %v2293_v56 }
 0x3fd   :  { %v1028_v53 = vmul.f32 2.0876756e-09, %v3520_v47  ;;  %v2297_v40 = vpack.c.bf16 %v1043_v62, %v1042_v28 }
 0x3fe   :  { %v1045_v51 = vadd.f32 %v1029_v60, %v3429_v34 }
 0x3ff   :  { %v1044_v30 = vadd.f32 %v1028_v53, %v3439_v4  ;;  %v3525_v39 = vpop.f32.mrb[28].mxu0  ;;  %2298 = vmatprep.subr.bf16.mxu1 %v2297_v40 }
 0x400   :  { %v1031_v31 = vmul.f32 2.0876756e-09, %v3525_v39  ;;  %v3528_v52 = vpop.f32.mrb[29].mxu0  ;;  %2300 = vmatpush3.bf16.msra.mxu1 %v2297_v40 }
 0x401   :  { %v1030_v46 = vmul.f32 2.0876756e-09, %v3528_v52  ;;  %v2301_v58 = vpack.c.bf16 %v1045_v51, %v1044_v30 }
 0x402   :  { %v1047_v9 = vadd.f32 %v1031_v31, %v3449_v5 }
 0x403   :  { %v1046_v13 = vadd.f32 %v1030_v46, %v3458_v54  ;;  %v3533_v44 = vpop.f32.mrb[30].mxu0  ;;  %2302 = vmatprep.subr.bf16.mxu1 %v2301_v58 }
 0x404   :  { %v1033_v34 = vmul.f32 2.0876756e-09, %v3533_v44  ;;  %v3536_v4 = vpop.f32.mrb[31].mxu0  ;;  %2304 = vmatpush3.bf16.msra.mxu1 %v2301_v58 }
 0x405   :  { %v1032_v3 = vmul.f32 2.0876756e-09, %v3536_v4  ;;  %v2305_v43 = vpack.c.bf16 %v1047_v9, %v1046_v13 }
 0x406   :  { %v1049_v56 = vadd.f32 %v1033_v34, %v3467_v41 }
 0x407   :  { %v1048_v62 = vadd.f32 %v1032_v3, %v3475_v19  ;;  %2306 = vmatprep.subr.bf16.mxu1 %v2305_v43 }
 0x408   :  { %2308 = vmatpush3.bf16.msra.mxu1 %v2305_v43 }
 0x409   :  { %v2309_v5 = vpack.c.bf16 %v1049_v56, %v1048_v62 }
 0x40b   :  { %2310 = vmatprep.subr.bf16.mxu1 %v2309_v5 }
 0x40c   :  { %2312 = vmatpush3.bf16.msra.mxu1 %v2309_v5 }
 0x40f   :  { %2050 = vmatmul.mubr.f32.vlgmr.msra.gmra.mrb[16].mxu1 %v3477_v18 }
 0x410   :  { %2052 = vmatprep.mubr.f32.mxu1 %v3491_v33 }
 0x413   :  { %2053 = vmatmul.mubr.f32.gmra.mrb[18].mxu1 %v3488_v50 }
 0x414   :  { %2055 = vmatprep.mubr.f32.mxu1 %v3499_v24 }
 0x417   :  { %2056 = vmatmul.mubr.f32.gmra.mrb[20].mxu1 %v3496_v16 }
 0x418   :  { %2058 = vmatprep.mubr.f32.mxu1 %v3507_v11 }
 0x41b   :  { %2059 = vmatmul.mubr.f32.gmra.mrb[22].mxu1 %v3504_v32 }
 0x41c   :  { %2061 = vmatprep.mubr.f32.mxu1 %v675_v20 }
 0x41f   :  { %2062 = vmatmul.mubr.f32.gmra.mrb[24].mxu1 %v3512_v45 }
 0x420   :  { %2064 = vmatprep.mubr.f32.mxu1 %v3520_v47 }
 0x423   :  { %2065 = vmatmul.mubr.f32.gmra.mrb[26].mxu1 %v3517_v42 }
 0x424   :  { %2067 = vmatprep.mubr.f32.mxu1 %v3528_v52 }
 0x427   :  { %2068 = vmatmul.mubr.f32.gmra.mrb[28].mxu1 %v3525_v39 }
 0x428   :  { %2070 = vmatprep.mubr.f32.mxu1 %v3536_v4 }
 0x42b   :  { %2071 = vmatmul.mubr.f32.gmra.mrb[30].mxu1 %v3533_v44 }
 0x42c   :  { %2117 = vmatprep.mubr.f32.mxu1 %v675_v20 }
 0x4e2   :  { %v2051_v54 = vpop.f32.mrb[16].mxu1 }
 0x4e3   :  { %v1196_v41 = vadd.f32 %v2051_v54, %v3338_v12  ;;  %v1116_v19 = vpop.f32.mrb[17].mxu1 }
 0x4e4   :  { %v1195_v28 = vadd.f32 %v1116_v19, %v3347_v17 }
 0x4e6   :  { %v2313_v60 = vpack.c.bf16 %v1196_v41, %v1195_v28  ;;  %v2054_v53 = vpop.f32.mrb[18].mxu1 }
 0x4e7   :  { %v1198_v40 = vadd.f32 %v2054_v53, %v3356_v36  ;;  %v1126_v51 = vpop.f32.mrb[19].mxu1 }
 0x4e8   :  { %v1197_v30 = vadd.f32 %v1126_v51, %v3365_v22  ;;  %2314 = vmatprep.subr.bf16.mxu0 %v2313_v60  ;;  %2377 = vmatprep.subr.bf16.mxu1 %v2313_v60  ;;  %v3912_v51 = vld [vmem:[#allocation8_spill] sm:$0xff] }
 0x4e9   :  { %2316 = vmatpush3.bf16.msra.mxu0 %v2313_v60  ;;  %2385 = vmatpush3.bf16.msra.mxu1 %v2313_v60 }
 0x4ea   :  { %v2317_v31 = vpack.c.bf16 %v1198_v40, %v1197_v30  ;;  %v2057_v46 = vpop.f32.mrb[20].mxu1 }
 0x4eb   :  { %v1200_v20 = vadd.f32 %v2057_v46, %v3374_v49  ;;  %v1136_v58 = vpop.f32.mrb[21].mxu1  ;;  %v3913_v46 = vld [vmem:[#allocation5_spill] sm:$0xff] }
 0x4ec   :  { %v1199_v12 = vadd.f32 %v1136_v58, %v3384_v23  ;;  %2318 = vmatprep.subr.bf16.mxu0 %v2317_v31  ;;  %2378 = vmatprep.subr.bf16.mxu1 %v2317_v31 }
 0x4ed   :  { %2320 = vmatpush3.bf16.msra.mxu0 %v2317_v31  ;;  %2386 = vmatpush3.bf16.msra.mxu1 %v2317_v31 }
 0x4ee   :  { %v2321_v17 = vpack.c.bf16 %v1200_v20, %v1199_v12  ;;  %v2060_v36 = vpop.f32.mrb[22].mxu1  ;;  %v3914_v12 = vld [vmem:[#allocation6_spill] sm:$0xff] }
 0x4ef   :  { %v1202_v9 = vadd.f32 %v2060_v36, %v3394_v25  ;;  %v1146_v22 = vpop.f32.mrb[23].mxu1 }
 0x4f0   :  { %v1201_v13 = vadd.f32 %v1146_v22, %v3404_v21  ;;  %2322 = vmatprep.subr.bf16.mxu0 %v2321_v17  ;;  %2379 = vmatprep.subr.bf16.mxu1 %v2321_v17 }
 0x4f1   :  { %2324 = vmatpush3.bf16.msra.mxu0 %v2321_v17  ;;  %2387 = vmatpush3.bf16.msra.mxu1 %v2321_v17 }
 0x4f2   :  { %v2325_v34 = vpack.c.bf16 %v1202_v9, %v1201_v13  ;;  %v2063_v49 = vpop.f32.mrb[24].mxu1 }
 0x4f3   :  { %v1204_v3 = vadd.f32 %v2063_v49, %v3414_v61  ;;  %v1156_v23 = vpop.f32.mrb[25].mxu1 }
 0x4f4   :  { %v1203_v43 = vadd.f32 %v1156_v23, %v3424_v15  ;;  %2326 = vmatprep.subr.bf16.mxu0 %v2325_v34  ;;  %2380 = vmatprep.subr.bf16.mxu1 %v2325_v34 }
 0x4f5   :  { %2328 = vmatpush3.bf16.msra.mxu0 %v2325_v34  ;;  %2388 = vmatpush3.bf16.msra.mxu1 %v2325_v34 }
 0x4f6   :  { %v2329_v56 = vpack.c.bf16 %v1204_v3, %v1203_v43  ;;  %v2066_v25 = vpop.f32.mrb[26].mxu1 }
 0x4f7   :  { %v1206_v62 = vadd.f32 %v2066_v25, %v3434_v27  ;;  %v1166_v21 = vpop.f32.mrb[27].mxu1 }
 0x4f8   :  { %v1205_v5 = vadd.f32 %v1166_v21, %v3444_v14  ;;  %2330 = vmatprep.subr.bf16.mxu0 %v2329_v56  ;;  %2381 = vmatprep.subr.bf16.mxu1 %v2329_v56 }
 0x4f9   :  { %2332 = vmatpush3.bf16.msra.mxu0 %v2329_v56  ;;  %2389 = vmatpush3.bf16.msra.mxu1 %v2329_v56 }
 0x4fa   :  { %v2333_v54 = vpack.c.bf16 %v1206_v62, %v1205_v5  ;;  %v2069_v61 = vpop.f32.mrb[28].mxu1 }
 0x4fb   :  { %v1208_v41 = vadd.f32 %v2069_v61, %v3453_v7  ;;  %v1176_v15 = vpop.f32.mrb[29].mxu1 }
 0x4fc   :  { %v1207_v19 = vadd.f32 %v1176_v15, %v3462_v38  ;;  %2334 = vmatprep.subr.bf16.mxu0 %v2333_v54  ;;  %2382 = vmatprep.subr.bf16.mxu1 %v2333_v54 }
 0x4fd   :  { %2336 = vmatpush3.bf16.msra.mxu0 %v2333_v54  ;;  %2390 = vmatpush3.bf16.msra.mxu1 %v2333_v54 }
 0x4fe   :  { %v2337_v28 = vpack.c.bf16 %v1208_v41, %v1207_v19  ;;  %v2072_v27 = vpop.f32.mrb[30].mxu1 }
 0x4ff   :  { %v1210_v60 = vadd.f32 %v2072_v27, %v3470_v29  ;;  %v1186_v14 = vpop.f32.mrb[31].mxu1 }
 0x500   :  { %v1209_v53 = vadd.f32 %v1186_v14, %v3480_v55  ;;  %2338 = vmatprep.subr.bf16.mxu0 %v2337_v28  ;;  %2383 = vmatprep.subr.bf16.mxu1 %v2337_v28 }
 0x501   :  { %2340 = vmatpush3.bf16.msra.mxu0 %v2337_v28  ;;  %2391 = vmatpush3.bf16.msra.mxu1 %v2337_v28 }
 0x502   :  { %v2341_v40 = vpack.c.bf16 %v1210_v60, %v1209_v53 }
 0x504   :  { %2342 = vmatprep.subr.bf16.mxu0 %v2341_v40  ;;  %2384 = vmatprep.subr.bf16.mxu1 %v2341_v40 }
 0x505   :  { %2344 = vmatpush3.bf16.msra.mxu0 %v2341_v40  ;;  %2392 = vmatpush3.bf16.msra.mxu1 %v2341_v40 }
 0x508   :  { %2106 = vmatmul.mubr.f32.vlgmr.msra.gmra.mrb[32].mxu0 %v3477_v18  ;;  %2118 = vmatmul.mubr.f32.vlgmr.msra.gmra.mrb[32].mxu1 %v3512_v45 }
 0x509   :  { %2108 = vmatprep.mubr.f32.mxu0 %v3491_v33  ;;  %2120 = vmatprep.mubr.f32.mxu1 %v3520_v47 }
 0x50c   :  { %2109 = vmatmul.mubr.f32.gmra.mrb[34].mxu0 %v3488_v50  ;;  %2121 = vmatmul.mubr.f32.gmra.mrb[34].mxu1 %v3517_v42 }
 0x50d   :  { %2111 = vmatprep.mubr.f32.mxu0 %v3499_v24  ;;  %2123 = vmatprep.mubr.f32.mxu1 %v3528_v52 }
 0x510   :  { %2112 = vmatmul.mubr.f32.gmra.mrb[36].mxu0 %v3496_v16  ;;  %2124 = vmatmul.mubr.f32.gmra.mrb[36].mxu1 %v3525_v39 }
 0x511   :  { %2114 = vmatprep.mubr.f32.mxu0 %v3507_v11  ;;  %2126 = vmatprep.mubr.f32.mxu1 %v3536_v4 }
 0x514   :  { %2115 = vmatmul.mubr.f32.gmra.mrb[38].mxu0 %v3504_v32  ;;  %2127 = vmatmul.mubr.f32.gmra.mrb[38].mxu1 %v3533_v44 }
 0x5db   :  { %v2107_v7 = vpop.f32.mrb[32].mxu0  ;;  %v2119_v38 = vpop.f32.mrb[32].mxu1 }
 0x5dc   :  { %v1357_v29 = vadd.f32 %v2107_v7, %v3341_v37   ;;  %v1365_v18 = vadd.f32 %v2119_v38, %v3417_v57   ;;  %v1277_v55 = vpop.f32.mrb[33].mxu0  ;;  %v1317_v50 = vpop.f32.mrb[33].mxu1 }
 0x5dd   :  { %v1356_v33 = vadd.f32 %v1277_v55, %v3350_v48   ;;  %v1364_v16 = vadd.f32 %v1317_v50, %v3427_v2  }
 0x5df   :  { %v2110_v24 = vpop.f32.mrb[34].mxu0  ;;  %v2122_v11 = vpop.f32.mrb[34].mxu1 }
 0x5e0   :  { %v1359_v45 = vadd.f32 %v2110_v24, %v3359_v59   ;;  %v1367_v32 = vadd.f32 %v2122_v11, %v3437_v35   ;;  %v1287_v42 = vpop.f32.mrb[35].mxu0  ;;  %v1327_v47 = vpop.f32.mrb[35].mxu1 }
 0x5e1   :  { %v1358_v39 = vadd.f32 %v1287_v42, %v3368_v0   ;;  %v1366_v37 = vadd.f32 %v1327_v47, %v3447_v26  }
 0x5e3   :  { %v2113_v52 = vpop.f32.mrb[36].mxu0  ;;  %v2125_v57 = vpop.f32.mrb[36].mxu1 }
 0x5e4   :  { %v1361_v44 = vadd.f32 %v2113_v52, %v3377_v1   ;;  %v1369_v48 = vadd.f32 %v2125_v57, %v3456_v8   ;;  %v1297_v4 = vpop.f32.mrb[37].mxu0  ;;  %v1337_v2 = vpop.f32.mrb[37].mxu1 }
 0x5e5   :  { %v1360_v30 = vadd.f32 %v1297_v4, %v3912_v51   ;;  %v1368_v59 = vadd.f32 %v1337_v2, %v3465_v10  }
 0x5e7   :  { %v2116_v31 = vpop.f32.mrb[38].mxu0  ;;  %v2128_v35 = vpop.f32.mrb[38].mxu1 }
 0x5e8   :  { %v1363_v20 = vadd.f32 %v2116_v31, %v3913_v46   ;;  %v1371_v0 = vadd.f32 %v2128_v35, %v3473_v63   ;;  %v1307_v58 = vpop.f32.mrb[39].mxu0  ;;  %v1347_v26 = vpop.f32.mrb[39].mxu1 }
 0x5e9   :  { %v1362_v17 = vadd.f32 %v1307_v58, %v3914_v12   ;;  %v1370_v1 = vadd.f32 %v1347_v26, %v3483_v6  }
 0x5ea LB: > { %v2345_v8 = vpack.c.bf16 %v2745_v29, %v2749_v33  ;;  %v2349_v10 = vpack.c.bf16 %v2737_v45, %v2741_v39  ;;  %2161 = vmatprep.mubr.f32.mxu0 %v2749_v33  ;;  %v2353_v63 = vpack.c.bf16 %v2729_v44, %v2733_v30  ;;  %2173 = vmatprep.mubr.f32.mxu1 %v2717_v16  ;;  %p1394_p11 = scmp.lt.s32.totalorder %s2753_s7, %s2417_s3  ;;  %s1377_s7 = sadd.s32 1, %s2753_s7   ;;  %s2753_s7 = sphi %s3633_s7, %s1377_s7   ;;  %v2749_v33 = vphi %v1356_v33, %v3931_v33   ;;  %v2745_v29 = vphi %v1357_v29, %v3930_v29   ;;  %v2741_v39 = vphi %v1358_v39, %v3929_v39   ;;  %v2737_v45 = vphi %v1359_v45, %v3928_v45   ;;  %v2733_v30 = vphi %v1360_v30, %v3927_v30   ;;  %v2729_v44 = vphi %v1361_v44, %v3926_v44   ;;  %v2725_v17 = vphi %v1362_v17, %v3925_v17   ;;  %v2721_v20 = vphi %v1363_v20, %v3924_v20   ;;  %v2717_v16 = vphi %v1364_v16, %v3923_v16   ;;  %v2713_v18 = vphi %v1365_v18, %v3922_v18   ;;  %v2709_v37 = vphi %v1366_v37, %v3921_v37   ;;  %v2705_v32 = vphi %v1367_v32, %v3920_v32   ;;  %v2701_v59 = vphi %v1368_v59, %v3919_v59   ;;  %v2697_v48 = vphi %v1369_v48, %v3918_v48   ;;  %v2693_v1 = vphi %v1370_v1, %v3917_v1   ;;  %v2689_v0 = vphi %v1371_v0, %v3916_v0  }
 0x5eb   : > { %v2357_v6 = vpack.c.bf16 %v2721_v20, %v2725_v17  ;;  %v2361_v36 = vpack.c.bf16 %v2713_v18, %v2717_v16  ;;  %v2365_v9 = vpack.c.bf16 %v2705_v32, %v2709_v37  ;;  %v2369_v22 = vpack.c.bf16 %v2697_v48, %v2701_v59  ;;  %p3754_p12 = scmp.ge.s32.totalorder %s1377_s7, 12  }
 0x5ec   : > { %2346 = vmatprep.subr.bf16.mxu0 %v2345_v8  ;;  %2393 = vmatprep.subr.bf16.mxu1 %v2345_v8  ;;  %v2373_v13 = vpack.c.bf16 %v2689_v0, %v2693_v1  ;;  %s1540_s8 = scalar_select %p1394_p11, 1, 0 }
 0x5ed   : > { %2348 = vmatpush3.bf16.msra.mxu0 %v2345_v8  ;;  %2401 = vmatpush3.bf16.msra.mxu1 %v2345_v8 }
 0x5ee   : > { %2350 = vmatprep.subr.bf16.mxu0 %v2349_v10  ;;  %2394 = vmatprep.subr.bf16.mxu1 %v2349_v10  ;;  %v1541_v34 = vstv %s1540_s8 }
 0x5ef   : > { %vm1542_vm0 = vcmp.eq.s32.totalorder %v1541_v34, 1 }
 0x5f1   : > { %2352 = vmatpush3.bf16.msra.mxu0 %v2349_v10  ;;  %2402 = vmatpush3.bf16.msra.mxu1 %v2349_v10 }
 0x5f2   : > { %2354 = vmatprep.subr.bf16.mxu0 %v2353_v63  ;;  %2395 = vmatprep.subr.bf16.mxu1 %v2353_v63 }
 0x5f5   : > { %2356 = vmatpush3.bf16.msra.mxu0 %v2353_v63  ;;  %2403 = vmatpush3.bf16.msra.mxu1 %v2353_v63 }
 0x5f6   : > { %2358 = vmatprep.subr.bf16.mxu0 %v2357_v6  ;;  %2396 = vmatprep.subr.bf16.mxu1 %v2357_v6 }
 0x5f9   : > { %2360 = vmatpush3.bf16.msra.mxu0 %v2357_v6  ;;  %2404 = vmatpush3.bf16.msra.mxu1 %v2357_v6 }
 0x5fa   : > { %2362 = vmatprep.subr.bf16.mxu0 %v2361_v36  ;;  %2397 = vmatprep.subr.bf16.mxu1 %v2361_v36 }
 0x5fd   : > { %2364 = vmatpush3.bf16.msra.mxu0 %v2361_v36  ;;  %2405 = vmatpush3.bf16.msra.mxu1 %v2361_v36 }
 0x5fe   : > { %2366 = vmatprep.subr.bf16.mxu0 %v2365_v9  ;;  %2398 = vmatprep.subr.bf16.mxu1 %v2365_v9 }
 0x601   : > { %2368 = vmatpush3.bf16.msra.mxu0 %v2365_v9  ;;  %2406 = vmatpush3.bf16.msra.mxu1 %v2365_v9 }
 0x602   : > { %2370 = vmatprep.subr.bf16.mxu0 %v2369_v22  ;;  %2399 = vmatprep.subr.bf16.mxu1 %v2369_v22 }
 0x605   : > { %2372 = vmatpush3.bf16.msra.mxu0 %v2369_v22  ;;  %2407 = vmatpush3.bf16.msra.mxu1 %v2369_v22 }
 0x606   : > { %2374 = vmatprep.subr.bf16.mxu0 %v2373_v13  ;;  %2400 = vmatprep.subr.bf16.mxu1 %v2373_v13 }
 0x609   : > { %2376 = vmatpush3.bf16.msra.mxu0 %v2373_v13  ;;  %2408 = vmatpush3.bf16.msra.mxu1 %v2373_v13 }
 0x60c   : > { %2162 = vmatmul.mubr.f32.vlgmr.msra.gmra.mrb[0].mxu0 %v2745_v29  ;;  %2174 = vmatmul.mubr.f32.vlgmr.msra.gmra.mrb[0].mxu1 %v2713_v18 }
 0x60d   : > { %2164 = vmatprep.mubr.f32.mxu0 %v2741_v39  ;;  %2176 = vmatprep.mubr.f32.mxu1 %v2709_v37 }
 0x610   : > { %2165 = vmatmul.mubr.f32.gmra.mrb[2].mxu0 %v2737_v45  ;;  %2177 = vmatmul.mubr.f32.gmra.mrb[2].mxu1 %v2705_v32 }
 0x611   : > { %2167 = vmatprep.mubr.f32.mxu0 %v2733_v30  ;;  %2179 = vmatprep.mubr.f32.mxu1 %v2701_v59 }
 0x614   : > { %2168 = vmatmul.mubr.f32.gmra.mrb[4].mxu0 %v2729_v44  ;;  %2180 = vmatmul.mubr.f32.gmra.mrb[4].mxu1 %v2697_v48 }
 0x615   : > { %2170 = vmatprep.mubr.f32.mxu0 %v2725_v17  ;;  %2182 = vmatprep.mubr.f32.mxu1 %v2693_v1 }
 0x618   : > { %2171 = vmatmul.mubr.f32.gmra.mrb[6].mxu0 %v2721_v20  ;;  %2183 = vmatmul.mubr.f32.gmra.mrb[6].mxu1 %v2689_v0 }
 0x6df   : > { %v2163_v49 = vpop.f32.mrb[0].mxu0  ;;  %v2175_v3 = vpop.f32.mrb[0].mxu1 }
 0x6e0   : > { %v1544_v23 = vsel %vm1542_vm0, %v2163_v49, %v2745_v29   ;;  %v1552_v43 = vsel %vm1542_vm0, %v2175_v3, %v2713_v18   ;;  %v1461_v56 = vpop.f32.mrb[1].mxu0  ;;  %v1501_v25 = vpop.f32.mrb[1].mxu1 }
 0x6e1   : > { %v1543_v62 = vsel %vm1542_vm0, %v1461_v56, %v2749_v33   ;;  %v1551_v21 = vsel %vm1542_vm0, %v1501_v25, %v2717_v16   ;;  %1560 = vst [vmem:[%s3843_s1 + $0x8] sm:$0xff] (%p3754_p12), %v1544_v23  ;;  %1568 = vst [vmem:[%s3843_s1 + $0x48] sm:$0xff] (%p3754_p12), %v1552_v43 }
 0x6e2   :  { %1559 = vst [vmem:[%s3843_s1] sm:$0xff] (%p3754_p12), %v1543_v62  ;;  %1567 = vst [vmem:[%s3843_s1 + $0x40] sm:$0xff] (%p3754_p12), %v1551_v21 }
 0x6e3   : > { %v2166_v5 = vpop.f32.mrb[2].mxu0  ;;  %v2178_v54 = vpop.f32.mrb[2].mxu1 }
 0x6e4   : > { %v1546_v61 = vsel %vm1542_vm0, %v2166_v5, %v2737_v45   ;;  %v1554_v41 = vsel %vm1542_vm0, %v2178_v54, %v2705_v32   ;;  %v1471_v15 = vpop.f32.mrb[3].mxu0  ;;  %v1511_v19 = vpop.f32.mrb[3].mxu1 }
 0x6e5   : > { %v1545_v28 = vsel %vm1542_vm0, %v1471_v15, %v2741_v39   ;;  %v1553_v27 = vsel %vm1542_vm0, %v1511_v19, %v2709_v37   ;;  %v3920_v32 = vmov %v1554_v41  ;;  %v3928_v45 = vmov %v1546_v61  ;;  %1562 = vst [vmem:[%s3843_s1 + $0x18] sm:$0xff] (%p3754_p12), %v1546_v61  ;;  %1570 = vst [vmem:[%s3843_s1 + $0x58] sm:$0xff] (%p3754_p12), %v1554_v41 }
 0x6e6   : > { %v3921_v37 = vmov %v1553_v27  ;;  %v3929_v39 = vmov %v1545_v28  ;;  %1561 = vst [vmem:[%s3843_s1 + $0x10] sm:$0xff] (%p3754_p12), %v1545_v28  ;;  %1569 = vst [vmem:[%s3843_s1 + $0x50] sm:$0xff] (%p3754_p12), %v1553_v27 }
 0x6e7   : > { %v2169_v60 = vpop.f32.mrb[4].mxu0  ;;  %v2181_v14 = vpop.f32.mrb[4].mxu1 }
 0x6e8   : > { %v1548_v53 = vsel %vm1542_vm0, %v2169_v60, %v2729_v44   ;;  %v1556_v40 = vsel %vm1542_vm0, %v2181_v14, %v2697_v48   ;;  %v1481_v7 = vpop.f32.mrb[5].mxu0  ;;  %v1521_v38 = vpop.f32.mrb[5].mxu1  ;;  %1376 = sbr.rel (!%p3754_p12) target bundleno = 1514 (0x5ea), region = 53 }
 0x6e9   : > { %v1547_v55 = vsel %vm1542_vm0, %v1481_v7, %v2733_v30   ;;  %v1555_v50 = vsel %vm1542_vm0, %v1521_v38, %v2701_v59   ;;  %v3918_v48 = vmov %v1556_v40  ;;  %v3926_v44 = vmov %v1548_v53  ;;  %1564 = vst [vmem:[%s3843_s1 + $0x28] sm:$0xff] (%p3754_p12), %v1548_v53  ;;  %1572 = vst [vmem:[%s3843_s1 + $0x68] sm:$0xff] (%p3754_p12), %v1556_v40 }
 0x6ea   : > { %v3919_v59 = vmov %v1555_v50  ;;  %v3927_v30 = vmov %v1547_v55  ;;  %1563 = vst [vmem:[%s3843_s1 + $0x20] sm:$0xff] (%p3754_p12), %v1547_v55  ;;  %1571 = vst [vmem:[%s3843_s1 + $0x60] sm:$0xff] (%p3754_p12), %v1555_v50 }
 0x6eb   : > { %v2172_v29 = vpop.f32.mrb[6].mxu0  ;;  %v2184_v18 = vpop.f32.mrb[6].mxu1 }
 0x6ec   : > { %v1550_v24 = vsel %vm1542_vm0, %v2172_v29, %v2721_v20   ;;  %v1558_v11 = vsel %vm1542_vm0, %v2184_v18, %v2689_v0   ;;  %v1491_v33 = vpop.f32.mrb[7].mxu0  ;;  %v1531_v16 = vpop.f32.mrb[7].mxu1  ;;  %v3922_v18 = vmov %v1552_v43  ;;  %v3930_v29 = vmov %v1544_v23 }
 0x6ed   : > { %v1549_v42 = vsel %vm1542_vm0, %v1491_v33, %v2725_v17   ;;  %v1557_v47 = vsel %vm1542_vm0, %v1531_v16, %v2693_v1   ;;  %v3916_v0 = vmov %v1558_v11  ;;  %v3923_v16 = vmov %v1551_v21  ;;  %1566 = vst [vmem:[%s3843_s1 + $0x38] sm:$0xff] (%p3754_p12), %v1550_v24  ;;  %1574 = vst [vmem:[%s3843_s1 + $0x78] sm:$0xff] (%p3754_p12), %v1558_v11 }
 0x6ee   : > { %v3917_v1 = vmov %v1557_v47  ;;  %v3924_v20 = vmov %v1550_v24  ;;  %v3925_v17 = vmov %v1549_v42  ;;  %v3931_v33 = vmov %v1543_v62  ;;  %1565 = vst [vmem:[%s3843_s1 + $0x30] sm:$0xff] (%p3754_p12), %v1549_v42  ;;  %1573 = vst [vmem:[%s3843_s1 + $0x70] sm:$0xff] (%p3754_p12), %v1557_v47 }
 0x6ef   :  { %1579 = vsyncpa [#allocation3], 1 }

</bundles_post_ra>
